<compile_context>
chip_gen: v7x
topology: tpu7x:2x2x1
jax: 0.10.0
libtpu: 0.0.40
codegen_flags: <defaults>
</compile_context>

<pallas_src>
import math

import jax
import jax.numpy as jnp
from jax.experimental import pallas as pl
from jax.experimental.pallas import tpu as pltpu


_MAX_BATCH_BLOCK = 256  # rows per grid step once the batch gets large


def _batch_block(batch):
    return batch if batch <= _MAX_BATCH_BLOCK else _MAX_BATCH_BLOCK


# ----------------------------------------------------------------------------
# In-kernel building blocks (operate on loaded values + weight refs)
# ----------------------------------------------------------------------------

def _linear(x, w_ref, b_ref, relu):
    h = jnp.dot(x, w_ref[...], preferred_element_type=jnp.float32) + b_ref[...]
    if relu:
        h = jnp.maximum(h, 0.0)
    return h


def _mlp_val(x, layer_refs, relu_last=False):
    """[Linear (+ReLU)]*: ReLU between layers, optional ReLU after the last."""
    n = len(layer_refs)
    for i, (w, b) in enumerate(layer_refs):
        x = _linear(x, w, b, relu=(i < n - 1) or relu_last)
    return x


def _attn_weight(xa, xb, w_ref, b_ref, vec_ref, bias_scalar):
    """exp( sum( ReLU([xa, xb] @ W + b) * vec, axis=1 ) + bias ) -> (N, 1).

    The concat is folded into a split matmul so xa/xb never leave VMEM."""
    d = xa.shape[1]
    h = (jnp.dot(xa, w_ref[0:d, :], preferred_element_type=jnp.float32)
         + jnp.dot(xb, w_ref[d:2 * d, :], preferred_element_type=jnp.float32)
         + b_ref[...])
    h = jnp.maximum(h, 0.0)
    s = jnp.sum(h * vec_ref[...], axis=1, keepdims=True) + bias_scalar
    # TODO(synk): exp with no max-subtraction matches the reference math but is
    # numerically fragile for large activations.
    return jnp.exp(s)


# ----------------------------------------------------------------------------
# Kernel factories (close over the static input layout)
# ----------------------------------------------------------------------------

def _make_fused_kernel(layout, n_in):
    def kernel(*refs):
        in_refs = refs[:n_in]
        (share_o, domain_o, pri_o, enc_o, dec_o, shdec_o, pred_o) = refs[n_in:]

        def refs_of(name):
            lo, hi = layout[name]
            return in_refs[lo:hi]

        def layer_refs(name):
            rs = refs_of(name)
            return [(rs[k], rs[k + 1]) for k in range(0, len(rs), 2)]

        u = refs_of("u_emb")[0][...]
        it = refs_of("i_emb")[0][...]
        u2 = refs_of("u2_emb")[0][...]
        at_bias = refs_of("at_bias")[0]          # (1, 4) in SMEM

        share_u = _mlp_val(u, layer_refs("shared"))
        share_o[...] = share_u

        # ReverseLayerF is identity in the forward pass (gradient reversal only).
        domain_o[...] = _mlp_val(share_u, layer_refs("pred_domain"))

        pri_u = _mlp_val(u, layer_refs("pri"))
        pri_o[...] = pri_u

        enc_i = _mlp_val(it, layer_refs("enc"))
        enc_o[...] = enc_i

        dec_o[...] = _mlp_val(enc_i, layer_refs("dec"))

        # shared_decoder(concat([pri_u, share_u], 1)) via a split first matmul.
        (w0, b0), (w1, b1) = layer_refs("shared_decoder")
        d = pri_u.shape[1]
        h = (jnp.dot(pri_u, w0[0:d, :], preferred_element_type=jnp.float32)
             + jnp.dot(share_u, w0[d:2 * d, :],
                       preferred_element_type=jnp.float32)
             + b0[...])
        h = jnp.maximum(h, 0.0)
        shdec_o[...] = (jnp.dot(h, w1[...], preferred_element_type=jnp.float32)
                        + b1[...])

        # Cross-domain mapping: other-domain private MLP then a single Linear.
        cross = _mlp_val(u2, layer_refs("other_pri"))
        (wc, bc), = layer_refs("cross")
        cross = (jnp.dot(cross, wc[...], preferred_element_type=jnp.float32)
                 + bc[...])

        # Attention pair 1/2 over (pri_u, cross) + weighted combine, all in VMEM.
        w1a = _attn_weight(pri_u, cross, *refs_of("attn1"), at_bias[0, 0])
        w2a = _attn_weight(pri_u, cross, *refs_of("attn2"), at_bias[0, 1])
        pri_comb = w1a * pri_u + w2a * cross

        # Attention pair 3/4 over (pri_comb, share_u) + weighted combine.
        w3a = _attn_weight(pri_comb, share_u, *refs_of("attn3"), at_bias[0, 2])
        w4a = _attn_weight(pri_comb, share_u, *refs_of("attn4"), at_bias[0, 3])
        domain_u = w3a * pri_comb + w4a * share_u

        # Predict heads + row-wise dot product, never leaving VMEM.
        pred_u = _mlp_val(domain_u, layer_refs("pred_user"))
        pred_i = _mlp_val(enc_i, layer_refs("pred_item"))
        pred_o[...] = jnp.sum(pred_u * pred_i, axis=1, keepdims=True)

    return kernel


def _make_shared_kernel(layout, n_in):
    def kernel(*refs):
        in_refs = refs[:n_in]
        share_o, domain_o = refs[n_in:]

        def refs_of(name):
            lo, hi = layout[name]
            return in_refs[lo:hi]

        def layer_refs(name):
            rs = refs_of(name)
            return [(rs[k], rs[k + 1]) for k in range(0, len(rs), 2)]

        u = refs_of("u_emb")[0][...]
        share_u = _mlp_val(u, layer_refs("shared"))
        share_o[...] = share_u
        domain_o[...] = _mlp_val(share_u, layer_refs("pred_domain"))

    return kernel


# ----------------------------------------------------------------------------
# Input packing helpers
# ----------------------------------------------------------------------------

def _flatten_layers(layers):
    out = []
    for w, b in layers:
        out.extend([w, b])
    return out


class _InputBuilder:
    """Collects flat kernel inputs + BlockSpecs + a name->slice layout."""

    def __init__(self, bb):
        self.bb = bb
        self.flat = []
        self.specs = []
        self.layout = {}

    def add(self, name, arrays, kind="param"):
        lo = len(self.flat)
        for a in arrays:
            self.flat.append(a)
            if kind == "batch":           # batch-tiled activation input
                self.specs.append(
                    pl.BlockSpec((self.bb,) + tuple(a.shape[1:]),
                                 lambda i: (i, 0)))
            elif kind == "smem":          # packed scalars -> SMEM
                self.specs.append(
                    pl.BlockSpec(tuple(a.shape),
                                 lambda i, n=a.ndim: (0,) * n,
                                 memory_space=pltpu.MemorySpace.SMEM))
            else:                         # whole parameter, VMEM-resident
                self.specs.append(
                    pl.BlockSpec(tuple(a.shape),
                                 lambda i, n=a.ndim: (0,) * n))
        self.layout[name] = (lo, len(self.flat))


# ----------------------------------------------------------------------------
# Fused forward wrappers
# ----------------------------------------------------------------------------

def _run_mode(params, names, u_emb, i_emb, u2_emb):
    s0, s1, s2, s3 = params["size"]
    batch = u_emb.shape[0]
    bb = _batch_block(batch)
    dom = names["dom"]

    ib = _InputBuilder(bb)
    ib.add("u_emb", [u_emb], kind="batch")
    ib.add("i_emb", [i_emb], kind="batch")
    ib.add("u2_emb", [u2_emb], kind="batch")
    ib.add("shared", _flatten_layers(params["shared"]))
    ib.add("pred_domain", _flatten_layers(params["shared_encoder_pred_domain"]))
    ib.add("pri", _flatten_layers(params[names["pri"]]))
    ib.add("enc", _flatten_layers(params[names["enc"]]))
    ib.add("dec", _flatten_layers(params[names["dec"]]))
    ib.add("shared_decoder", _flatten_layers(params["shared_decoder"]))
    ib.add("other_pri", _flatten_layers(params[names["other_pri"]]))
    ib.add("cross", _flatten_layers(params[names["cross"]]))
    ib.add("pred_user", _flatten_layers(params[names["pred_user"]]))
    ib.add("pred_item", _flatten_layers(params[names["pred_item"]]))
    for idx in (1, 2, 3, 4):
        w, b = params[f"attention{idx}{dom}"]
        ib.add(f"attn{idx}", [w, b, params[f"atVec{idx}{dom}"]])
    at_bias = jnp.concatenate(
        [params[f"atBias{idx}{dom}"] for idx in (1, 2, 3, 4)], axis=1)  # (1, 4)
    ib.add("at_bias", [at_bias], kind="smem")

    n_in = len(ib.flat)
    out_dims = [s3, 2, s3, s3, s0, s0, 1]
    out_shape = [jax.ShapeDtypeStruct((batch, d), jnp.float32) for d in out_dims]
    out_specs = [pl.BlockSpec((bb, d), lambda i: (i, 0)) for d in out_dims]

    outs = pl.pallas_call(
        _make_fused_kernel(ib.layout, n_in),
        grid=(pl.cdiv(batch, bb),),
        in_specs=ib.specs,
        out_specs=out_specs,
        out_shape=out_shape,
        compiler_params=pltpu.CompilerParams(
            dimension_semantics=("parallel",)),
    )(*ib.flat)

    share_u, domain_label, pri_u, enc_i, dec_i, sharedecoder, predict = outs
    return [share_u, domain_label, pri_u, enc_i, dec_i, sharedecoder,
            predict[:, 0]]


def _run_shared_only(params, u_emb):
    s0, s1, s2, s3 = params["size"]
    batch = u_emb.shape[0]
    bb = _batch_block(batch)

    ib = _InputBuilder(bb)
    ib.add("u_emb", [u_emb], kind="batch")
    ib.add("shared", _flatten_layers(params["shared"]))
    ib.add("pred_domain", _flatten_layers(params["shared_encoder_pred_domain"]))

    n_in = len(ib.flat)
    out_dims = [s3, 2]
    outs = pl.pallas_call(
        _make_shared_kernel(ib.layout, n_in),
        grid=(pl.cdiv(batch, bb),),
        in_specs=ib.specs,
        out_specs=[pl.BlockSpec((bb, d), lambda i: (i, 0)) for d in out_dims],
        out_shape=[jax.ShapeDtypeStruct((batch, d), jnp.float32)
                   for d in out_dims],
        compiler_params=pltpu.CompilerParams(
            dimension_semantics=("parallel",)),
    )(*ib.flat)
    return list(outs)


def madd_forward(params, u_embedding, i_embedding, u2_embedding, mode, p=0.0):
    # TODO(synk): `p` / ReverseLayerF only affect the backward pass (gradient
    # reversal); the forward here matches the PyTorch module in eval mode.
    if mode == 0:
        names = dict(pri="priA", enc="encoderA", dec="decoderA",
                     other_pri="priB", cross="B2A", dom="A",
                     pred_user="predict_user_A", pred_item="predict_item_A")
        return _run_mode(params, names, u_embedding, i_embedding, u2_embedding)
    if mode == 1:
        names = dict(pri="priB", enc="encoderB", dec="decoderB",
                     other_pri="priA", cross="A2B", dom="B",
                     pred_user="predict_user_B", pred_item="predict_item_B")
        return _run_mode(params, names, u_embedding, i_embedding, u2_embedding)
    return _run_shared_only(params, u_embedding)


# ----------------------------------------------------------------------------
# Deterministic parameter initialization (shapes from MADD.__init__)
# ----------------------------------------------------------------------------

def _init_linear(key, fan_in, fan_out):
    kw, kb = jax.random.split(key)
    bound = 1.0 / math.sqrt(fan_in)
    w = jax.random.uniform(kw, (fan_in, fan_out), jnp.float32, -bound, bound)
    b = jax.random.uniform(kb, (1, fan_out), jnp.float32, -bound, bound)
    return w, b


def _init_mlp(key, dims):
    keys = jax.random.split(key, len(dims) - 1)
    return [_init_linear(k, dims[i], dims[i + 1]) for i, k in enumerate(keys)]


def init_madd_params(key, size):
    s = (size * 2, size, size // 2, size // 4)
    params = {"size": s}
    names_3layer = ["priA", "priB", "shared", "encoderA", "encoderB"]
    keys = jax.random.split(key, 64)
    ki = iter(range(64))

    for name in names_3layer:
        params[name] = _init_mlp(keys[next(ki)], [s[0], s[1], s[2], s[3]])
    params["shared_encoder_pred_domain"] = _init_mlp(keys[next(ki)], [s[3], s[3], 2])
    params["shared_decoder"] = _init_mlp(keys[next(ki)], [s[2], s[1], s[0]])
    params["decoderA"] = _init_mlp(keys[next(ki)], [s[3], s[2], s[1], s[0]])
    params["decoderB"] = _init_mlp(keys[next(ki)], [s[3], s[2], s[1], s[0]])
    for name in ["predict_user_A", "predict_item_A",
                 "predict_user_B", "predict_item_B"]:
        params[name] = _init_mlp(keys[next(ki)], [s[3], s[3] * 2, s[3]])
    params["A2B"] = _init_mlp(keys[next(ki)], [s[3], s[3]])
    params["B2A"] = _init_mlp(keys[next(ki)], [s[3], s[3]])

    for dom in ["A", "B"]:
        for idx in range(1, 5):
            k_att = keys[next(ki)]
            k_vec = keys[next(ki)]
            params[f"attention{idx}{dom}"] = _init_linear(k_att, s[3] * 2, s[3])
            params[f"atVec{idx}{dom}"] = jax.random.normal(k_vec, (1, s[3]), jnp.float32)
            params[f"atBias{idx}{dom}"] = jnp.zeros((1, 1), jnp.float32)
    return params


# ----------------------------------------------------------------------------
# Pure-JAX reference of the PyTorch forward (for correctness checking)
# ----------------------------------------------------------------------------

def _ref_mlp(x, layers):
    n = len(layers)
    for i, (w, b) in enumerate(layers):
        x = x @ w + b
        if i < n - 1:
            x = jnp.maximum(x, 0.0)
    return x


def madd_forward_ref(params, u, i_emb, u2, mode):
    results = []
    share_u = _ref_mlp(u, params["shared"])
    results.append(share_u)
    results.append(_ref_mlp(share_u, params["shared_encoder_pred_domain"]))
    if mode == 0:
        pri, enc, dec, other, cross, dom, pu, pi = (
            "priA", "encoderA", "decoderA", "priB", "B2A", "A",
            "predict_user_A", "predict_item_A")
    elif mode == 1:
        pri, enc, dec, other, cross, dom, pu, pi = (
            "priB", "encoderB", "decoderB", "priA", "A2B", "B",
            "predict_user_B", "predict_item_B")
    else:
        return results
    pri_u = _ref_mlp(u, params[pri]); results.append(pri_u)
    enc_i = _ref_mlp(i_emb, params[enc]); results.append(enc_i)
    results.append(_ref_mlp(enc_i, params[dec]))
    results.append(_ref_mlp(jnp.concatenate([pri_u, share_u], axis=1),
                            params["shared_decoder"]))
    crossv = _ref_mlp(_ref_mlp(u2, params[other]), params[cross])

    def attw(tmp, idx):
        w, b = params[f"attention{idx}{dom}"]
        h = jnp.maximum(tmp @ w + b, 0.0)
        s = (jnp.sum(h * params[f"atVec{idx}{dom}"], axis=1, keepdims=True)
             + params[f"atBias{idx}{dom}"][0, 0])
        return jnp.exp(s)

    tmp_p = jnp.concatenate([pri_u, crossv], axis=1)
    w1, w2 = attw(tmp_p, 1), attw(tmp_p, 2)
    pri_comb = w1 * pri_u + w2 * crossv
    tmp_ps = jnp.concatenate([pri_comb, share_u], axis=1)
    w3, w4 = attw(tmp_ps, 3), attw(tmp_ps, 4)
    domain_u = w3 * pri_comb + w4 * share_u
    pred = jnp.sum(_ref_mlp(domain_u, params[pu]) * _ref_mlp(enc_i, params[pi]),
                   axis=1)
    results.append(pred)
    return results


# ----------------------------------------------------------------------------
# Demo
# ----------------------------------------------------------------------------

if __name__ == "__main__":
    SIZE = 32          # args.size  -> feature sizes (64, 32, 16, 8)
    BATCH = 8

    root = jax.random.PRNGKey(0)
    k_params, k_u, k_i, k_u2 = jax.random.split(root, 4)

    params = init_madd_params(k_params, SIZE)
    feat = SIZE * 2
    u_emb = jax.random.normal(k_u, (BATCH, feat), jnp.float32)
    i_emb = jax.random.normal(k_i, (BATCH, feat), jnp.float32)
    u2_emb = jax.random.normal(k_u2, (BATCH, feat), jnp.float32)

    out_mode0 = madd_forward(params, u_emb, i_emb, u2_emb, mode=0, p=0.0)
    out_mode1 = madd_forward(params, u_emb, i_emb, u2_emb, mode=1, p=0.0)
    out_mode2 = madd_forward(params, u_emb, i_emb, u2_emb, mode=2, p=0.0)
    jax.block_until_ready(out_mode0)
    jax.block_until_ready(out_mode1)
    jax.block_until_ready(out_mode2)

    expected = [(BATCH, 8), (BATCH, 2), (BATCH, 8), (BATCH, 8),
                (BATCH, feat), (BATCH, feat), (BATCH,)]
    assert [tuple(o.shape) for o in out_mode0] == expected
    assert [tuple(o.shape) for o in out_mode1] == expected
    assert [tuple(o.shape) for o in out_mode2] == expected[:2]

    # Validate the fused kernel against a pure-JAX reference of the forward.
    for mode, outs in ((0, out_mode0), (1, out_mode1), (2, out_mode2)):
        refs = madd_forward_ref(params, u_emb, i_emb, u2_emb, mode)
        assert len(refs) == len(outs)
        for o, r in zip(outs, refs):
            assert o.shape == r.shape
            assert bool(jnp.all(jnp.isfinite(o)))
            assert bool(jnp.allclose(o, r, rtol=2e-2, atol=2e-2)), (
                "max abs diff %e" % float(jnp.max(jnp.abs(o - r))))

    print("KERNEL_OK")
</pallas_src>

<mosaic_0001>
module attributes {stable_mosaic.version = 11 : i64} {
  func.func @kernel(%arg0: i32, %arg1: memref<8x64xf32, #tpu.memory_space<vmem>>, %arg2: memref<8x64xf32, #tpu.memory_space<vmem>>, %arg3: memref<8x64xf32, #tpu.memory_space<vmem>>, %arg4: memref<64x32xf32, #tpu.memory_space<vmem>>, %arg5: memref<1x32xf32, #tpu.memory_space<vmem>>, %arg6: memref<32x16xf32, #tpu.memory_space<vmem>>, %arg7: memref<1x16xf32, #tpu.memory_space<vmem>>, %arg8: memref<16x8xf32, #tpu.memory_space<vmem>>, %arg9: memref<1x8xf32, #tpu.memory_space<vmem>>, %arg10: memref<8x8xf32, #tpu.memory_space<vmem>>, %arg11: memref<1x8xf32, #tpu.memory_space<vmem>>, %arg12: memref<8x2xf32, #tpu.memory_space<vmem>>, %arg13: memref<1x2xf32, #tpu.memory_space<vmem>>, %arg14: memref<64x32xf32, #tpu.memory_space<vmem>>, %arg15: memref<1x32xf32, #tpu.memory_space<vmem>>, %arg16: memref<32x16xf32, #tpu.memory_space<vmem>>, %arg17: memref<1x16xf32, #tpu.memory_space<vmem>>, %arg18: memref<16x8xf32, #tpu.memory_space<vmem>>, %arg19: memref<1x8xf32, #tpu.memory_space<vmem>>, %arg20: memref<64x32xf32, #tpu.memory_space<vmem>>, %arg21: memref<1x32xf32, #tpu.memory_space<vmem>>, %arg22: memref<32x16xf32, #tpu.memory_space<vmem>>, %arg23: memref<1x16xf32, #tpu.memory_space<vmem>>, %arg24: memref<16x8xf32, #tpu.memory_space<vmem>>, %arg25: memref<1x8xf32, #tpu.memory_space<vmem>>, %arg26: memref<8x16xf32, #tpu.memory_space<vmem>>, %arg27: memref<1x16xf32, #tpu.memory_space<vmem>>, %arg28: memref<16x32xf32, #tpu.memory_space<vmem>>, %arg29: memref<1x32xf32, #tpu.memory_space<vmem>>, %arg30: memref<32x64xf32, #tpu.memory_space<vmem>>, %arg31: memref<1x64xf32, #tpu.memory_space<vmem>>, %arg32: memref<16x32xf32, #tpu.memory_space<vmem>>, %arg33: memref<1x32xf32, #tpu.memory_space<vmem>>, %arg34: memref<32x64xf32, #tpu.memory_space<vmem>>, %arg35: memref<1x64xf32, #tpu.memory_space<vmem>>, %arg36: memref<64x32xf32, #tpu.memory_space<vmem>>, %arg37: memref<1x32xf32, #tpu.memory_space<vmem>>, %arg38: memref<32x16xf32, #tpu.memory_space<vmem>>, %arg39: memref<1x16xf32, #tpu.memory_space<vmem>>, %arg40: memref<16x8xf32, #tpu.memory_space<vmem>>, %arg41: memref<1x8xf32, #tpu.memory_space<vmem>>, %arg42: memref<8x8xf32, #tpu.memory_space<vmem>>, %arg43: memref<1x8xf32, #tpu.memory_space<vmem>>, %arg44: memref<8x16xf32, #tpu.memory_space<vmem>>, %arg45: memref<1x16xf32, #tpu.memory_space<vmem>>, %arg46: memref<16x8xf32, #tpu.memory_space<vmem>>, %arg47: memref<1x8xf32, #tpu.memory_space<vmem>>, %arg48: memref<8x16xf32, #tpu.memory_space<vmem>>, %arg49: memref<1x16xf32, #tpu.memory_space<vmem>>, %arg50: memref<16x8xf32, #tpu.memory_space<vmem>>, %arg51: memref<1x8xf32, #tpu.memory_space<vmem>>, %arg52: memref<16x8xf32, #tpu.memory_space<vmem>>, %arg53: memref<1x8xf32, #tpu.memory_space<vmem>>, %arg54: memref<1x8xf32, #tpu.memory_space<vmem>>, %arg55: memref<16x8xf32, #tpu.memory_space<vmem>>, %arg56: memref<1x8xf32, #tpu.memory_space<vmem>>, %arg57: memref<1x8xf32, #tpu.memory_space<vmem>>, %arg58: memref<16x8xf32, #tpu.memory_space<vmem>>, %arg59: memref<1x8xf32, #tpu.memory_space<vmem>>, %arg60: memref<1x8xf32, #tpu.memory_space<vmem>>, %arg61: memref<16x8xf32, #tpu.memory_space<vmem>>, %arg62: memref<1x8xf32, #tpu.memory_space<vmem>>, %arg63: memref<1x8xf32, #tpu.memory_space<vmem>>, %arg64: memref<1x4xf32, #tpu.memory_space<smem>>, %arg65: memref<8x8xf32, #tpu.memory_space<vmem>>, %arg66: memref<8x2xf32, #tpu.memory_space<vmem>>, %arg67: memref<8x8xf32, #tpu.memory_space<vmem>>, %arg68: memref<8x8xf32, #tpu.memory_space<vmem>>, %arg69: memref<8x64xf32, #tpu.memory_space<vmem>>, %arg70: memref<8x64xf32, #tpu.memory_space<vmem>>, %arg71: memref<8x1xf32, #tpu.memory_space<vmem>>) attributes {dimension_semantics = [#tpu.dimension_semantics<parallel>], iteration_bounds = array<i64: 1>, scalar_prefetch = 0 : i64, scratch_operands = 0 : i64, tpu.core_type = #tpu.core_type<tc>, window_params = [{transform_indices = @transform_0, window_bounds = array<i64: 8, 64>}, {transform_indices = @transform_1, window_bounds = array<i64: 8, 64>}, {transform_indices = @transform_2, window_bounds = array<i64: 8, 64>}, {pipeline_mode = #tpu.pipeline_mode<synchronous>, transform_indices = @transform_3, window_bounds = array<i64: 64, 32>}, {pipeline_mode = #tpu.pipeline_mode<synchronous>, transform_indices = @transform_4, window_bounds = array<i64: 1, 32>}, {pipeline_mode = #tpu.pipeline_mode<synchronous>, transform_indices = @transform_5, window_bounds = array<i64: 32, 16>}, {pipeline_mode = #tpu.pipeline_mode<synchronous>, transform_indices = @transform_6, window_bounds = array<i64: 1, 16>}, {pipeline_mode = #tpu.pipeline_mode<synchronous>, transform_indices = @transform_7, window_bounds = array<i64: 16, 8>}, {pipeline_mode = #tpu.pipeline_mode<synchronous>, transform_indices = @transform_8, window_bounds = array<i64: 1, 8>}, {pipeline_mode = #tpu.pipeline_mode<synchronous>, transform_indices = @transform_9, window_bounds = array<i64: 8, 8>}, {pipeline_mode = #tpu.pipeline_mode<synchronous>, transform_indices = @transform_10, window_bounds = array<i64: 1, 8>}, {pipeline_mode = #tpu.pipeline_mode<synchronous>, transform_indices = @transform_11, window_bounds = array<i64: 8, 2>}, {pipeline_mode = #tpu.pipeline_mode<synchronous>, transform_indices = @transform_12, window_bounds = array<i64: 1, 2>}, {pipeline_mode = #tpu.pipeline_mode<synchronous>, transform_indices = @transform_13, window_bounds = array<i64: 64, 32>}, {pipeline_mode = #tpu.pipeline_mode<synchronous>, transform_indices = @transform_14, window_bounds = array<i64: 1, 32>}, {pipeline_mode = #tpu.pipeline_mode<synchronous>, transform_indices = @transform_15, window_bounds = array<i64: 32, 16>}, {pipeline_mode = #tpu.pipeline_mode<synchronous>, transform_indices = @transform_16, window_bounds = array<i64: 1, 16>}, {pipeline_mode = #tpu.pipeline_mode<synchronous>, transform_indices = @transform_17, window_bounds = array<i64: 16, 8>}, {pipeline_mode = #tpu.pipeline_mode<synchronous>, transform_indices = @transform_18, window_bounds = array<i64: 1, 8>}, {pipeline_mode = #tpu.pipeline_mode<synchronous>, transform_indices = @transform_19, window_bounds = array<i64: 64, 32>}, {pipeline_mode = #tpu.pipeline_mode<synchronous>, transform_indices = @transform_20, window_bounds = array<i64: 1, 32>}, {pipeline_mode = #tpu.pipeline_mode<synchronous>, transform_indices = @transform_21, window_bounds = array<i64: 32, 16>}, {pipeline_mode = #tpu.pipeline_mode<synchronous>, transform_indices = @transform_22, window_bounds = array<i64: 1, 16>}, {pipeline_mode = #tpu.pipeline_mode<synchronous>, transform_indices = @transform_23, window_bounds = array<i64: 16, 8>}, {pipeline_mode = #tpu.pipeline_mode<synchronous>, transform_indices = @transform_24, window_bounds = array<i64: 1, 8>}, {pipeline_mode = #tpu.pipeline_mode<synchronous>, transform_indices = @transform_25, window_bounds = array<i64: 8, 16>}, {pipeline_mode = #tpu.pipeline_mode<synchronous>, transform_indices = @transform_26, window_bounds = array<i64: 1, 16>}, {pipeline_mode = #tpu.pipeline_mode<synchronous>, transform_indices = @transform_27, window_bounds = array<i64: 16, 32>}, {pipeline_mode = #tpu.pipeline_mode<synchronous>, transform_indices = @transform_28, window_bounds = array<i64: 1, 32>}, {pipeline_mode = #tpu.pipeline_mode<synchronous>, transform_indices = @transform_29, window_bounds = array<i64: 32, 64>}, {pipeline_mode = #tpu.pipeline_mode<synchronous>, transform_indices = @transform_30, window_bounds = array<i64: 1, 64>}, {pipeline_mode = #tpu.pipeline_mode<synchronous>, transform_indices = @transform_31, window_bounds = array<i64: 16, 32>}, {pipeline_mode = #tpu.pipeline_mode<synchronous>, transform_indices = @transform_32, window_bounds = array<i64: 1, 32>}, {pipeline_mode = #tpu.pipeline_mode<synchronous>, transform_indices = @transform_33, window_bounds = array<i64: 32, 64>}, {pipeline_mode = #tpu.pipeline_mode<synchronous>, transform_indices = @transform_34, window_bounds = array<i64: 1, 64>}, {pipeline_mode = #tpu.pipeline_mode<synchronous>, transform_indices = @transform_35, window_bounds = array<i64: 64, 32>}, {pipeline_mode = #tpu.pipeline_mode<synchronous>, transform_indices = @transform_36, window_bounds = array<i64: 1, 32>}, {pipeline_mode = #tpu.pipeline_mode<synchronous>, transform_indices = @transform_37, window_bounds = array<i64: 32, 16>}, {pipeline_mode = #tpu.pipeline_mode<synchronous>, transform_indices = @transform_38, window_bounds = array<i64: 1, 16>}, {pipeline_mode = #tpu.pipeline_mode<synchronous>, transform_indices = @transform_39, window_bounds = array<i64: 16, 8>}, {pipeline_mode = #tpu.pipeline_mode<synchronous>, transform_indices = @transform_40, window_bounds = array<i64: 1, 8>}, {pipeline_mode = #tpu.pipeline_mode<synchronous>, transform_indices = @transform_41, window_bounds = array<i64: 8, 8>}, {pipeline_mode = #tpu.pipeline_mode<synchronous>, transform_indices = @transform_42, window_bounds = array<i64: 1, 8>}, {pipeline_mode = #tpu.pipeline_mode<synchronous>, transform_indices = @transform_43, window_bounds = array<i64: 8, 16>}, {pipeline_mode = #tpu.pipeline_mode<synchronous>, transform_indices = @transform_44, window_bounds = array<i64: 1, 16>}, {pipeline_mode = #tpu.pipeline_mode<synchronous>, transform_indices = @transform_45, window_bounds = array<i64: 16, 8>}, {pipeline_mode = #tpu.pipeline_mode<synchronous>, transform_indices = @transform_46, window_bounds = array<i64: 1, 8>}, {pipeline_mode = #tpu.pipeline_mode<synchronous>, transform_indices = @transform_47, window_bounds = array<i64: 8, 16>}, {pipeline_mode = #tpu.pipeline_mode<synchronous>, transform_indices = @transform_48, window_bounds = array<i64: 1, 16>}, {pipeline_mode = #tpu.pipeline_mode<synchronous>, transform_indices = @transform_49, window_bounds = array<i64: 16, 8>}, {pipeline_mode = #tpu.pipeline_mode<synchronous>, transform_indices = @transform_50, window_bounds = array<i64: 1, 8>}, {pipeline_mode = #tpu.pipeline_mode<synchronous>, transform_indices = @transform_51, window_bounds = array<i64: 16, 8>}, {pipeline_mode = #tpu.pipeline_mode<synchronous>, transform_indices = @transform_52, window_bounds = array<i64: 1, 8>}, {pipeline_mode = #tpu.pipeline_mode<synchronous>, transform_indices = @transform_53, window_bounds = array<i64: 1, 8>}, {pipeline_mode = #tpu.pipeline_mode<synchronous>, transform_indices = @transform_54, window_bounds = array<i64: 16, 8>}, {pipeline_mode = #tpu.pipeline_mode<synchronous>, transform_indices = @transform_55, window_bounds = array<i64: 1, 8>}, {pipeline_mode = #tpu.pipeline_mode<synchronous>, transform_indices = @transform_56, window_bounds = array<i64: 1, 8>}, {pipeline_mode = #tpu.pipeline_mode<synchronous>, transform_indices = @transform_57, window_bounds = array<i64: 16, 8>}, {pipeline_mode = #tpu.pipeline_mode<synchronous>, transform_indices = @transform_58, window_bounds = array<i64: 1, 8>}, {pipeline_mode = #tpu.pipeline_mode<synchronous>, transform_indices = @transform_59, window_bounds = array<i64: 1, 8>}, {pipeline_mode = #tpu.pipeline_mode<synchronous>, transform_indices = @transform_60, window_bounds = array<i64: 16, 8>}, {pipeline_mode = #tpu.pipeline_mode<synchronous>, transform_indices = @transform_61, window_bounds = array<i64: 1, 8>}, {pipeline_mode = #tpu.pipeline_mode<synchronous>, transform_indices = @transform_62, window_bounds = array<i64: 1, 8>}, {transform_indices = @transform_63, window_bounds = array<i64: 1, 4>}, {transform_indices = @transform_64, window_bounds = array<i64: 8, 8>}, {transform_indices = @transform_65, window_bounds = array<i64: 8, 2>}, {transform_indices = @transform_66, window_bounds = array<i64: 8, 8>}, {transform_indices = @transform_67, window_bounds = array<i64: 8, 8>}, {transform_indices = @transform_68, window_bounds = array<i64: 8, 64>}, {transform_indices = @transform_69, window_bounds = array<i64: 8, 64>}, {transform_indices = @transform_70, window_bounds = array<i64: 8, 1>}]} {
    %c0 = arith.constant 0 : index
    %c0_0 = arith.constant 0 : index
    %0 = vector.load %arg1[%c0, %c0_0] : memref<8x64xf32, #tpu.memory_space<vmem>>, vector<8x64xf32>
    %c0_1 = arith.constant 0 : index
    %c0_2 = arith.constant 0 : index
    %1 = vector.load %arg2[%c0_1, %c0_2] : memref<8x64xf32, #tpu.memory_space<vmem>>, vector<8x64xf32>
    %c0_3 = arith.constant 0 : index
    %c0_4 = arith.constant 0 : index
    %2 = vector.load %arg3[%c0_3, %c0_4] : memref<8x64xf32, #tpu.memory_space<vmem>>, vector<8x64xf32>
    %c0_5 = arith.constant 0 : index
    %c0_6 = arith.constant 0 : index
    %3 = vector.load %arg4[%c0_5, %c0_6] : memref<64x32xf32, #tpu.memory_space<vmem>>, vector<64x32xf32>
    %cst = arith.constant dense<0.000000e+00> : vector<8x32xf32>
    %4 = tpu.matmul %0, %3, %cst {dimension_numbers = #tpu.dot_dimension_numbers<[1], [0], [0], [1], [0, 0, 1, 1], [], []>} : vector<8x64xf32>, vector<64x32xf32>, vector<8x32xf32> -> vector<8x32xf32>
    %c0_7 = arith.constant 0 : index
    %c0_8 = arith.constant 0 : index
    %5 = vector.load %arg5[%c0_7, %c0_8] : memref<1x32xf32, #tpu.memory_space<vmem>>, vector<1x32xf32>
    %6 = vector.broadcast %5 : vector<1x32xf32> to vector<8x32xf32>
    %7 = arith.addf %4, %6 : vector<8x32xf32>
    %cst_9 = arith.constant 0.000000e+00 : f32
    %8 = vector.broadcast %cst_9 : f32 to vector<8x32xf32>
    %9 = arith.maximumf %7, %8 : vector<8x32xf32>
    %c0_10 = arith.constant 0 : index
    %c0_11 = arith.constant 0 : index
    %10 = vector.load %arg6[%c0_10, %c0_11] : memref<32x16xf32, #tpu.memory_space<vmem>>, vector<32x16xf32>
    %cst_12 = arith.constant dense<0.000000e+00> : vector<8x16xf32>
    %11 = tpu.matmul %9, %10, %cst_12 {dimension_numbers = #tpu.dot_dimension_numbers<[1], [0], [0], [1], [0, 0, 1, 1], [], []>} : vector<8x32xf32>, vector<32x16xf32>, vector<8x16xf32> -> vector<8x16xf32>
    %c0_13 = arith.constant 0 : index
    %c0_14 = arith.constant 0 : index
    %12 = vector.load %arg7[%c0_13, %c0_14] : memref<1x16xf32, #tpu.memory_space<vmem>>, vector<1x16xf32>
    %13 = vector.broadcast %12 : vector<1x16xf32> to vector<8x16xf32>
    %14 = arith.addf %11, %13 : vector<8x16xf32>
    %cst_15 = arith.constant 0.000000e+00 : f32
    %15 = vector.broadcast %cst_15 : f32 to vector<8x16xf32>
    %16 = arith.maximumf %14, %15 : vector<8x16xf32>
    %c0_16 = arith.constant 0 : index
    %c0_17 = arith.constant 0 : index
    %17 = vector.load %arg8[%c0_16, %c0_17] : memref<16x8xf32, #tpu.memory_space<vmem>>, vector<16x8xf32>
    %cst_18 = arith.constant dense<0.000000e+00> : vector<8x8xf32>
    %18 = tpu.matmul %16, %17, %cst_18 {dimension_numbers = #tpu.dot_dimension_numbers<[1], [0], [0], [1], [0, 0, 1, 1], [], []>} : vector<8x16xf32>, vector<16x8xf32>, vector<8x8xf32> -> vector<8x8xf32>
    %c0_19 = arith.constant 0 : index
    %c0_20 = arith.constant 0 : index
    %19 = vector.load %arg9[%c0_19, %c0_20] : memref<1x8xf32, #tpu.memory_space<vmem>>, vector<1x8xf32>
    %20 = vector.broadcast %19 : vector<1x8xf32> to vector<8x8xf32>
    %21 = arith.addf %18, %20 : vector<8x8xf32>
    %c0_21 = arith.constant 0 : index
    %c0_22 = arith.constant 0 : index
    %22 = vector.load %arg65[%c0_21, %c0_22] : memref<8x8xf32, #tpu.memory_space<vmem>>, vector<8x8xf32>
    tpu.vector_store %arg65[%c0_21, %c0_22], %21 {strides = array<i32>} : memref<8x8xf32, #tpu.memory_space<vmem>>, vector<8x8xf32>,
    %c0_23 = arith.constant 0 : index
    %c0_24 = arith.constant 0 : index
    %23 = vector.load %arg10[%c0_23, %c0_24] : memref<8x8xf32, #tpu.memory_space<vmem>>, vector<8x8xf32>
    %cst_25 = arith.constant dense<0.000000e+00> : vector<8x8xf32>
    %24 = tpu.matmul %21, %23, %cst_25 {dimension_numbers = #tpu.dot_dimension_numbers<[1], [0], [0], [1], [0, 0, 1, 1], [], []>} : vector<8x8xf32>, vector<8x8xf32>, vector<8x8xf32> -> vector<8x8xf32>
    %c0_26 = arith.constant 0 : index
    %c0_27 = arith.constant 0 : index
    %25 = vector.load %arg11[%c0_26, %c0_27] : memref<1x8xf32, #tpu.memory_space<vmem>>, vector<1x8xf32>
    %26 = vector.broadcast %25 : vector<1x8xf32> to vector<8x8xf32>
    %27 = arith.addf %24, %26 : vector<8x8xf32>
    %cst_28 = arith.constant 0.000000e+00 : f32
    %28 = vector.broadcast %cst_28 : f32 to vector<8x8xf32>
    %29 = arith.maximumf %27, %28 : vector<8x8xf32>
    %c0_29 = arith.constant 0 : index
    %c0_30 = arith.constant 0 : index
    %30 = vector.load %arg12[%c0_29, %c0_30] : memref<8x2xf32, #tpu.memory_space<vmem>>, vector<8x2xf32>
    %cst_31 = arith.constant dense<0.000000e+00> : vector<8x2xf32>
    %31 = tpu.matmul %29, %30, %cst_31 {dimension_numbers = #tpu.dot_dimension_numbers<[1], [0], [0], [1], [0, 0, 1, 1], [], []>} : vector<8x8xf32>, vector<8x2xf32>, vector<8x2xf32> -> vector<8x2xf32>
    %c0_32 = arith.constant 0 : index
    %c0_33 = arith.constant 0 : index
    %32 = vector.load %arg13[%c0_32, %c0_33] : memref<1x2xf32, #tpu.memory_space<vmem>>, vector<1x2xf32>
    %33 = vector.broadcast %32 : vector<1x2xf32> to vector<8x2xf32>
    %34 = arith.addf %31, %33 : vector<8x2xf32>
    %c0_34 = arith.constant 0 : index
    %c0_35 = arith.constant 0 : index
    %35 = vector.load %arg66[%c0_34, %c0_35] : memref<8x2xf32, #tpu.memory_space<vmem>>, vector<8x2xf32>
    tpu.vector_store %arg66[%c0_34, %c0_35], %34 {strides = array<i32>} : memref<8x2xf32, #tpu.memory_space<vmem>>, vector<8x2xf32>,
    %c0_36 = arith.constant 0 : index
    %c0_37 = arith.constant 0 : index
    %36 = vector.load %arg14[%c0_36, %c0_37] : memref<64x32xf32, #tpu.memory_space<vmem>>, vector<64x32xf32>
    %cst_38 = arith.constant dense<0.000000e+00> : vector<8x32xf32>
    %37 = tpu.matmul %0, %36, %cst_38 {dimension_numbers = #tpu.dot_dimension_numbers<[1], [0], [0], [1], [0, 0, 1, 1], [], []>} : vector<8x64xf32>, vector<64x32xf32>, vector<8x32xf32> -> vector<8x32xf32>
    %c0_39 = arith.constant 0 : index
    %c0_40 = arith.constant 0 : index
    %38 = vector.load %arg15[%c0_39, %c0_40] : memref<1x32xf32, #tpu.memory_space<vmem>>, vector<1x32xf32>
    %39 = vector.broadcast %38 : vector<1x32xf32> to vector<8x32xf32>
    %40 = arith.addf %37, %39 : vector<8x32xf32>
    %cst_41 = arith.constant 0.000000e+00 : f32
    %41 = vector.broadcast %cst_41 : f32 to vector<8x32xf32>
    %42 = arith.maximumf %40, %41 : vector<8x32xf32>
    %c0_42 = arith.constant 0 : index
    %c0_43 = arith.constant 0 : index
    %43 = vector.load %arg16[%c0_42, %c0_43] : memref<32x16xf32, #tpu.memory_space<vmem>>, vector<32x16xf32>
    %cst_44 = arith.constant dense<0.000000e+00> : vector<8x16xf32>
    %44 = tpu.matmul %42, %43, %cst_44 {dimension_numbers = #tpu.dot_dimension_numbers<[1], [0], [0], [1], [0, 0, 1, 1], [], []>} : vector<8x32xf32>, vector<32x16xf32>, vector<8x16xf32> -> vector<8x16xf32>
    %c0_45 = arith.constant 0 : index
    %c0_46 = arith.constant 0 : index
    %45 = vector.load %arg17[%c0_45, %c0_46] : memref<1x16xf32, #tpu.memory_space<vmem>>, vector<1x16xf32>
    %46 = vector.broadcast %45 : vector<1x16xf32> to vector<8x16xf32>
    %47 = arith.addf %44, %46 : vector<8x16xf32>
    %cst_47 = arith.constant 0.000000e+00 : f32
    %48 = vector.broadcast %cst_47 : f32 to vector<8x16xf32>
    %49 = arith.maximumf %47, %48 : vector<8x16xf32>
    %c0_48 = arith.constant 0 : index
    %c0_49 = arith.constant 0 : index
    %50 = vector.load %arg18[%c0_48, %c0_49] : memref<16x8xf32, #tpu.memory_space<vmem>>, vector<16x8xf32>
    %cst_50 = arith.constant dense<0.000000e+00> : vector<8x8xf32>
    %51 = tpu.matmul %49, %50, %cst_50 {dimension_numbers = #tpu.dot_dimension_numbers<[1], [0], [0], [1], [0, 0, 1, 1], [], []>} : vector<8x16xf32>, vector<16x8xf32>, vector<8x8xf32> -> vector<8x8xf32>
    %c0_51 = arith.constant 0 : index
    %c0_52 = arith.constant 0 : index
    %52 = vector.load %arg19[%c0_51, %c0_52] : memref<1x8xf32, #tpu.memory_space<vmem>>, vector<1x8xf32>
    %53 = vector.broadcast %52 : vector<1x8xf32> to vector<8x8xf32>
    %54 = arith.addf %51, %53 : vector<8x8xf32>
    %c0_53 = arith.constant 0 : index
    %c0_54 = arith.constant 0 : index
    %55 = vector.load %arg67[%c0_53, %c0_54] : memref<8x8xf32, #tpu.memory_space<vmem>>, vector<8x8xf32>
    tpu.vector_store %arg67[%c0_53, %c0_54], %54 {strides = array<i32>} : memref<8x8xf32, #tpu.memory_space<vmem>>, vector<8x8xf32>,
    %c0_55 = arith.constant 0 : index
    %c0_56 = arith.constant 0 : index
    %56 = vector.load %arg20[%c0_55, %c0_56] : memref<64x32xf32, #tpu.memory_space<vmem>>, vector<64x32xf32>
    %cst_57 = arith.constant dense<0.000000e+00> : vector<8x32xf32>
    %57 = tpu.matmul %1, %56, %cst_57 {dimension_numbers = #tpu.dot_dimension_numbers<[1], [0], [0], [1], [0, 0, 1, 1], [], []>} : vector<8x64xf32>, vector<64x32xf32>, vector<8x32xf32> -> vector<8x32xf32>
    %c0_58 = arith.constant 0 : index
    %c0_59 = arith.constant 0 : index
    %58 = vector.load %arg21[%c0_58, %c0_59] : memref<1x32xf32, #tpu.memory_space<vmem>>, vector<1x32xf32>
    %59 = vector.broadcast %58 : vector<1x32xf32> to vector<8x32xf32>
    %60 = arith.addf %57, %59 : vector<8x32xf32>
    %cst_60 = arith.constant 0.000000e+00 : f32
    %61 = vector.broadcast %cst_60 : f32 to vector<8x32xf32>
    %62 = arith.maximumf %60, %61 : vector<8x32xf32>
    %c0_61 = arith.constant 0 : index
    %c0_62 = arith.constant 0 : index
    %63 = vector.load %arg22[%c0_61, %c0_62] : memref<32x16xf32, #tpu.memory_space<vmem>>, vector<32x16xf32>
    %cst_63 = arith.constant dense<0.000000e+00> : vector<8x16xf32>
    %64 = tpu.matmul %62, %63, %cst_63 {dimension_numbers = #tpu.dot_dimension_numbers<[1], [0], [0], [1], [0, 0, 1, 1], [], []>} : vector<8x32xf32>, vector<32x16xf32>, vector<8x16xf32> -> vector<8x16xf32>
    %c0_64 = arith.constant 0 : index
    %c0_65 = arith.constant 0 : index
    %65 = vector.load %arg23[%c0_64, %c0_65] : memref<1x16xf32, #tpu.memory_space<vmem>>, vector<1x16xf32>
    %66 = vector.broadcast %65 : vector<1x16xf32> to vector<8x16xf32>
    %67 = arith.addf %64, %66 : vector<8x16xf32>
    %cst_66 = arith.constant 0.000000e+00 : f32
    %68 = vector.broadcast %cst_66 : f32 to vector<8x16xf32>
    %69 = arith.maximumf %67, %68 : vector<8x16xf32>
    %c0_67 = arith.constant 0 : index
    %c0_68 = arith.constant 0 : index
    %70 = vector.load %arg24[%c0_67, %c0_68] : memref<16x8xf32, #tpu.memory_space<vmem>>, vector<16x8xf32>
    %cst_69 = arith.constant dense<0.000000e+00> : vector<8x8xf32>
    %71 = tpu.matmul %69, %70, %cst_69 {dimension_numbers = #tpu.dot_dimension_numbers<[1], [0], [0], [1], [0, 0, 1, 1], [], []>} : vector<8x16xf32>, vector<16x8xf32>, vector<8x8xf32> -> vector<8x8xf32>
    %c0_70 = arith.constant 0 : index
    %c0_71 = arith.constant 0 : index
    %72 = vector.load %arg25[%c0_70, %c0_71] : memref<1x8xf32, #tpu.memory_space<vmem>>, vector<1x8xf32>
    %73 = vector.broadcast %72 : vector<1x8xf32> to vector<8x8xf32>
    %74 = arith.addf %71, %73 : vector<8x8xf32>
    %c0_72 = arith.constant 0 : index
    %c0_73 = arith.constant 0 : index
    %75 = vector.load %arg68[%c0_72, %c0_73] : memref<8x8xf32, #tpu.memory_space<vmem>>, vector<8x8xf32>
    tpu.vector_store %arg68[%c0_72, %c0_73], %74 {strides = array<i32>} : memref<8x8xf32, #tpu.memory_space<vmem>>, vector<8x8xf32>,
    %c0_74 = arith.constant 0 : index
    %c0_75 = arith.constant 0 : index
    %76 = vector.load %arg26[%c0_74, %c0_75] : memref<8x16xf32, #tpu.memory_space<vmem>>, vector<8x16xf32>
    %cst_76 = arith.constant dense<0.000000e+00> : vector<8x16xf32>
    %77 = tpu.matmul %74, %76, %cst_76 {dimension_numbers = #tpu.dot_dimension_numbers<[1], [0], [0], [1], [0, 0, 1, 1], [], []>} : vector<8x8xf32>, vector<8x16xf32>, vector<8x16xf32> -> vector<8x16xf32>
    %c0_77 = arith.constant 0 : index
    %c0_78 = arith.constant 0 : index
    %78 = vector.load %arg27[%c0_77, %c0_78] : memref<1x16xf32, #tpu.memory_space<vmem>>, vector<1x16xf32>
    %79 = vector.broadcast %78 : vector<1x16xf32> to vector<8x16xf32>
    %80 = arith.addf %77, %79 : vector<8x16xf32>
    %cst_79 = arith.constant 0.000000e+00 : f32
    %81 = vector.broadcast %cst_79 : f32 to vector<8x16xf32>
    %82 = arith.maximumf %80, %81 : vector<8x16xf32>
    %c0_80 = arith.constant 0 : index
    %c0_81 = arith.constant 0 : index
    %83 = vector.load %arg28[%c0_80, %c0_81] : memref<16x32xf32, #tpu.memory_space<vmem>>, vector<16x32xf32>
    %cst_82 = arith.constant dense<0.000000e+00> : vector<8x32xf32>
    %84 = tpu.matmul %82, %83, %cst_82 {dimension_numbers = #tpu.dot_dimension_numbers<[1], [0], [0], [1], [0, 0, 1, 1], [], []>} : vector<8x16xf32>, vector<16x32xf32>, vector<8x32xf32> -> vector<8x32xf32>
    %c0_83 = arith.constant 0 : index
    %c0_84 = arith.constant 0 : index
    %85 = vector.load %arg29[%c0_83, %c0_84] : memref<1x32xf32, #tpu.memory_space<vmem>>, vector<1x32xf32>
    %86 = vector.broadcast %85 : vector<1x32xf32> to vector<8x32xf32>
    %87 = arith.addf %84, %86 : vector<8x32xf32>
    %cst_85 = arith.constant 0.000000e+00 : f32
    %88 = vector.broadcast %cst_85 : f32 to vector<8x32xf32>
    %89 = arith.maximumf %87, %88 : vector<8x32xf32>
    %c0_86 = arith.constant 0 : index
    %c0_87 = arith.constant 0 : index
    %90 = vector.load %arg30[%c0_86, %c0_87] : memref<32x64xf32, #tpu.memory_space<vmem>>, vector<32x64xf32>
    %cst_88 = arith.constant dense<0.000000e+00> : vector<8x64xf32>
    %91 = tpu.matmul %89, %90, %cst_88 {dimension_numbers = #tpu.dot_dimension_numbers<[1], [0], [0], [1], [0, 0, 1, 1], [], []>} : vector<8x32xf32>, vector<32x64xf32>, vector<8x64xf32> -> vector<8x64xf32>
    %c0_89 = arith.constant 0 : index
    %c0_90 = arith.constant 0 : index
    %92 = vector.load %arg31[%c0_89, %c0_90] : memref<1x64xf32, #tpu.memory_space<vmem>>, vector<1x64xf32>
    %93 = vector.broadcast %92 : vector<1x64xf32> to vector<8x64xf32>
    %94 = arith.addf %91, %93 : vector<8x64xf32>
    %c0_91 = arith.constant 0 : index
    %c0_92 = arith.constant 0 : index
    %95 = vector.load %arg69[%c0_91, %c0_92] : memref<8x64xf32, #tpu.memory_space<vmem>>, vector<8x64xf32>
    tpu.vector_store %arg69[%c0_91, %c0_92], %94 {strides = array<i32>} : memref<8x64xf32, #tpu.memory_space<vmem>>, vector<8x64xf32>,
    %c0_93 = arith.constant 0 : index
    %c0_94 = arith.constant 0 : index
    %96 = vector.load %arg32[%c0_93, %c0_94] : memref<16x32xf32, #tpu.memory_space<vmem>>, vector<8x32xf32>
    %cst_95 = arith.constant dense<0.000000e+00> : vector<8x32xf32>
    %97 = tpu.matmul %54, %96, %cst_95 {dimension_numbers = #tpu.dot_dimension_numbers<[1], [0], [0], [1], [0, 0, 1, 1], [], []>} : vector<8x8xf32>, vector<8x32xf32>, vector<8x32xf32> -> vector<8x32xf32>
    %c8 = arith.constant 8 : index
    %c0_96 = arith.constant 0 : index
    %98 = vector.load %arg32[%c8, %c0_96] : memref<16x32xf32, #tpu.memory_space<vmem>>, vector<8x32xf32>
    %cst_97 = arith.constant dense<0.000000e+00> : vector<8x32xf32>
    %99 = tpu.matmul %21, %98, %cst_97 {dimension_numbers = #tpu.dot_dimension_numbers<[1], [0], [0], [1], [0, 0, 1, 1], [], []>} : vector<8x8xf32>, vector<8x32xf32>, vector<8x32xf32> -> vector<8x32xf32>
    %100 = arith.addf %97, %99 : vector<8x32xf32>
    %c0_98 = arith.constant 0 : index
    %c0_99 = arith.constant 0 : index
    %101 = vector.load %arg33[%c0_98, %c0_99] : memref<1x32xf32, #tpu.memory_space<vmem>>, vector<1x32xf32>
    %102 = vector.broadcast %101 : vector<1x32xf32> to vector<8x32xf32>
    %103 = arith.addf %100, %102 : vector<8x32xf32>
    %cst_100 = arith.constant 0.000000e+00 : f32
    %104 = vector.broadcast %cst_100 : f32 to vector<8x32xf32>
    %105 = arith.maximumf %103, %104 : vector<8x32xf32>
    %c0_101 = arith.constant 0 : index
    %c0_102 = arith.constant 0 : index
    %106 = vector.load %arg34[%c0_101, %c0_102] : memref<32x64xf32, #tpu.memory_space<vmem>>, vector<32x64xf32>
    %cst_103 = arith.constant dense<0.000000e+00> : vector<8x64xf32>
    %107 = tpu.matmul %105, %106, %cst_103 {dimension_numbers = #tpu.dot_dimension_numbers<[1], [0], [0], [1], [0, 0, 1, 1], [], []>} : vector<8x32xf32>, vector<32x64xf32>, vector<8x64xf32> -> vector<8x64xf32>
    %c0_104 = arith.constant 0 : index
    %c0_105 = arith.constant 0 : index
    %108 = vector.load %arg35[%c0_104, %c0_105] : memref<1x64xf32, #tpu.memory_space<vmem>>, vector<1x64xf32>
    %109 = vector.broadcast %108 : vector<1x64xf32> to vector<8x64xf32>
    %110 = arith.addf %107, %109 : vector<8x64xf32>
    %c0_106 = arith.constant 0 : index
    %c0_107 = arith.constant 0 : index
    %111 = vector.load %arg70[%c0_106, %c0_107] : memref<8x64xf32, #tpu.memory_space<vmem>>, vector<8x64xf32>
    tpu.vector_store %arg70[%c0_106, %c0_107], %110 {strides = array<i32>} : memref<8x64xf32, #tpu.memory_space<vmem>>, vector<8x64xf32>,
    %c0_108 = arith.constant 0 : index
    %c0_109 = arith.constant 0 : index
    %112 = vector.load %arg36[%c0_108, %c0_109] : memref<64x32xf32, #tpu.memory_space<vmem>>, vector<64x32xf32>
    %cst_110 = arith.constant dense<0.000000e+00> : vector<8x32xf32>
    %113 = tpu.matmul %2, %112, %cst_110 {dimension_numbers = #tpu.dot_dimension_numbers<[1], [0], [0], [1], [0, 0, 1, 1], [], []>} : vector<8x64xf32>, vector<64x32xf32>, vector<8x32xf32> -> vector<8x32xf32>
    %c0_111 = arith.constant 0 : index
    %c0_112 = arith.constant 0 : index
    %114 = vector.load %arg37[%c0_111, %c0_112] : memref<1x32xf32, #tpu.memory_space<vmem>>, vector<1x32xf32>
    %115 = vector.broadcast %114 : vector<1x32xf32> to vector<8x32xf32>
    %116 = arith.addf %113, %115 : vector<8x32xf32>
    %cst_113 = arith.constant 0.000000e+00 : f32
    %117 = vector.broadcast %cst_113 : f32 to vector<8x32xf32>
    %118 = arith.maximumf %116, %117 : vector<8x32xf32>
    %c0_114 = arith.constant 0 : index
    %c0_115 = arith.constant 0 : index
    %119 = vector.load %arg38[%c0_114, %c0_115] : memref<32x16xf32, #tpu.memory_space<vmem>>, vector<32x16xf32>
    %cst_116 = arith.constant dense<0.000000e+00> : vector<8x16xf32>
    %120 = tpu.matmul %118, %119, %cst_116 {dimension_numbers = #tpu.dot_dimension_numbers<[1], [0], [0], [1], [0, 0, 1, 1], [], []>} : vector<8x32xf32>, vector<32x16xf32>, vector<8x16xf32> -> vector<8x16xf32>
    %c0_117 = arith.constant 0 : index
    %c0_118 = arith.constant 0 : index
    %121 = vector.load %arg39[%c0_117, %c0_118] : memref<1x16xf32, #tpu.memory_space<vmem>>, vector<1x16xf32>
    %122 = vector.broadcast %121 : vector<1x16xf32> to vector<8x16xf32>
    %123 = arith.addf %120, %122 : vector<8x16xf32>
    %cst_119 = arith.constant 0.000000e+00 : f32
    %124 = vector.broadcast %cst_119 : f32 to vector<8x16xf32>
    %125 = arith.maximumf %123, %124 : vector<8x16xf32>
    %c0_120 = arith.constant 0 : index
    %c0_121 = arith.constant 0 : index
    %126 = vector.load %arg40[%c0_120, %c0_121] : memref<16x8xf32, #tpu.memory_space<vmem>>, vector<16x8xf32>
    %cst_122 = arith.constant dense<0.000000e+00> : vector<8x8xf32>
    %127 = tpu.matmul %125, %126, %cst_122 {dimension_numbers = #tpu.dot_dimension_numbers<[1], [0], [0], [1], [0, 0, 1, 1], [], []>} : vector<8x16xf32>, vector<16x8xf32>, vector<8x8xf32> -> vector<8x8xf32>
    %c0_123 = arith.constant 0 : index
    %c0_124 = arith.constant 0 : index
    %128 = vector.load %arg41[%c0_123, %c0_124] : memref<1x8xf32, #tpu.memory_space<vmem>>, vector<1x8xf32>
    %129 = vector.broadcast %128 : vector<1x8xf32> to vector<8x8xf32>
    %130 = arith.addf %127, %129 : vector<8x8xf32>
    %c0_125 = arith.constant 0 : index
    %c0_126 = arith.constant 0 : index
    %131 = vector.load %arg42[%c0_125, %c0_126] : memref<8x8xf32, #tpu.memory_space<vmem>>, vector<8x8xf32>
    %cst_127 = arith.constant dense<0.000000e+00> : vector<8x8xf32>
    %132 = tpu.matmul %130, %131, %cst_127 {dimension_numbers = #tpu.dot_dimension_numbers<[1], [0], [0], [1], [0, 0, 1, 1], [], []>} : vector<8x8xf32>, vector<8x8xf32>, vector<8x8xf32> -> vector<8x8xf32>
    %c0_128 = arith.constant 0 : index
    %c0_129 = arith.constant 0 : index
    %133 = vector.load %arg43[%c0_128, %c0_129] : memref<1x8xf32, #tpu.memory_space<vmem>>, vector<1x8xf32>
    %134 = vector.broadcast %133 : vector<1x8xf32> to vector<8x8xf32>
    %135 = arith.addf %132, %134 : vector<8x8xf32>
    %c0_130 = arith.constant 0 : index
    %c0_131 = arith.constant 0 : index
    %136 = memref.load %arg64[%c0_130, %c0_131] : memref<1x4xf32, #tpu.memory_space<smem>>
    %c0_132 = arith.constant 0 : index
    %c0_133 = arith.constant 0 : index
    %137 = vector.load %arg52[%c0_132, %c0_133] : memref<16x8xf32, #tpu.memory_space<vmem>>, vector<8x8xf32>
    %cst_134 = arith.constant dense<0.000000e+00> : vector<8x8xf32>
    %138 = tpu.matmul %54, %137, %cst_134 {dimension_numbers = #tpu.dot_dimension_numbers<[1], [0], [0], [1], [0, 0, 1, 1], [], []>} : vector<8x8xf32>, vector<8x8xf32>, vector<8x8xf32> -> vector<8x8xf32>
    %c8_135 = arith.constant 8 : index
    %c0_136 = arith.constant 0 : index
    %139 = vector.load %arg52[%c8_135, %c0_136] : memref<16x8xf32, #tpu.memory_space<vmem>>, vector<8x8xf32>
    %cst_137 = arith.constant dense<0.000000e+00> : vector<8x8xf32>
    %140 = tpu.matmul %135, %139, %cst_137 {dimension_numbers = #tpu.dot_dimension_numbers<[1], [0], [0], [1], [0, 0, 1, 1], [], []>} : vector<8x8xf32>, vector<8x8xf32>, vector<8x8xf32> -> vector<8x8xf32>
    %141 = arith.addf %138, %140 : vector<8x8xf32>
    %c0_138 = arith.constant 0 : index
    %c0_139 = arith.constant 0 : index
    %142 = vector.load %arg53[%c0_138, %c0_139] : memref<1x8xf32, #tpu.memory_space<vmem>>, vector<1x8xf32>
    %143 = vector.broadcast %142 : vector<1x8xf32> to vector<8x8xf32>
    %144 = arith.addf %141, %143 : vector<8x8xf32>
    %cst_140 = arith.constant 0.000000e+00 : f32
    %145 = vector.broadcast %cst_140 : f32 to vector<8x8xf32>
    %146 = arith.maximumf %144, %145 : vector<8x8xf32>
    %c0_141 = arith.constant 0 : index
    %c0_142 = arith.constant 0 : index
    %147 = vector.load %arg54[%c0_141, %c0_142] : memref<1x8xf32, #tpu.memory_space<vmem>>, vector<1x8xf32>
    %148 = vector.broadcast %147 : vector<1x8xf32> to vector<8x8xf32>
    %149 = arith.mulf %146, %148 : vector<8x8xf32>
    %cst_143 = arith.constant dense<0.000000e+00> : vector<8xf32>
    %150 = vector.multi_reduction <add>, %149, %cst_143 [1] : vector<8x8xf32> to vector<8xf32>
    %151 = vector.shape_cast %150 : vector<8xf32> to vector<8x1xf32>
    %152 = vector.broadcast %136 : f32 to vector<8x1xf32>
    %153 = arith.addf %151, %152 : vector<8x1xf32>
    %154 = math.exp %153 : vector<8x1xf32>
    %c0_144 = arith.constant 0 : index
    %c1 = arith.constant 1 : index
    %155 = memref.load %arg64[%c0_144, %c1] : memref<1x4xf32, #tpu.memory_space<smem>>
    %c0_145 = arith.constant 0 : index
    %c0_146 = arith.constant 0 : index
    %156 = vector.load %arg55[%c0_145, %c0_146] : memref<16x8xf32, #tpu.memory_space<vmem>>, vector<8x8xf32>
    %cst_147 = arith.constant dense<0.000000e+00> : vector<8x8xf32>
    %157 = tpu.matmul %54, %156, %cst_147 {dimension_numbers = #tpu.dot_dimension_numbers<[1], [0], [0], [1], [0, 0, 1, 1], [], []>} : vector<8x8xf32>, vector<8x8xf32>, vector<8x8xf32> -> vector<8x8xf32>
    %c8_148 = arith.constant 8 : index
    %c0_149 = arith.constant 0 : index
    %158 = vector.load %arg55[%c8_148, %c0_149] : memref<16x8xf32, #tpu.memory_space<vmem>>, vector<8x8xf32>
    %cst_150 = arith.constant dense<0.000000e+00> : vector<8x8xf32>
    %159 = tpu.matmul %135, %158, %cst_150 {dimension_numbers = #tpu.dot_dimension_numbers<[1], [0], [0], [1], [0, 0, 1, 1], [], []>} : vector<8x8xf32>, vector<8x8xf32>, vector<8x8xf32> -> vector<8x8xf32>
    %160 = arith.addf %157, %159 : vector<8x8xf32>
    %c0_151 = arith.constant 0 : index
    %c0_152 = arith.constant 0 : index
    %161 = vector.load %arg56[%c0_151, %c0_152] : memref<1x8xf32, #tpu.memory_space<vmem>>, vector<1x8xf32>
    %162 = vector.broadcast %161 : vector<1x8xf32> to vector<8x8xf32>
    %163 = arith.addf %160, %162 : vector<8x8xf32>
    %cst_153 = arith.constant 0.000000e+00 : f32
    %164 = vector.broadcast %cst_153 : f32 to vector<8x8xf32>
    %165 = arith.maximumf %163, %164 : vector<8x8xf32>
    %c0_154 = arith.constant 0 : index
    %c0_155 = arith.constant 0 : index
    %166 = vector.load %arg57[%c0_154, %c0_155] : memref<1x8xf32, #tpu.memory_space<vmem>>, vector<1x8xf32>
    %167 = vector.broadcast %166 : vector<1x8xf32> to vector<8x8xf32>
    %168 = arith.mulf %165, %167 : vector<8x8xf32>
    %cst_156 = arith.constant dense<0.000000e+00> : vector<8xf32>
    %169 = vector.multi_reduction <add>, %168, %cst_156 [1] : vector<8x8xf32> to vector<8xf32>
    %170 = vector.shape_cast %169 : vector<8xf32> to vector<8x1xf32>
    %171 = vector.broadcast %155 : f32 to vector<8x1xf32>
    %172 = arith.addf %170, %171 : vector<8x1xf32>
    %173 = math.exp %172 : vector<8x1xf32>
    %174 = vector.broadcast %154 : vector<8x1xf32> to vector<8x8xf32>
    %175 = arith.mulf %174, %54 : vector<8x8xf32>
    %176 = vector.broadcast %173 : vector<8x1xf32> to vector<8x8xf32>
    %177 = arith.mulf %176, %135 : vector<8x8xf32>
    %178 = arith.addf %175, %177 : vector<8x8xf32>
    %c0_157 = arith.constant 0 : index
    %c2 = arith.constant 2 : index
    %179 = memref.load %arg64[%c0_157, %c2] : memref<1x4xf32, #tpu.memory_space<smem>>
    %c0_158 = arith.constant 0 : index
    %c0_159 = arith.constant 0 : index
    %180 = vector.load %arg58[%c0_158, %c0_159] : memref<16x8xf32, #tpu.memory_space<vmem>>, vector<8x8xf32>
    %cst_160 = arith.constant dense<0.000000e+00> : vector<8x8xf32>
    %181 = tpu.matmul %178, %180, %cst_160 {dimension_numbers = #tpu.dot_dimension_numbers<[1], [0], [0], [1], [0, 0, 1, 1], [], []>} : vector<8x8xf32>, vector<8x8xf32>, vector<8x8xf32> -> vector<8x8xf32>
    %c8_161 = arith.constant 8 : index
    %c0_162 = arith.constant 0 : index
    %182 = vector.load %arg58[%c8_161, %c0_162] : memref<16x8xf32, #tpu.memory_space<vmem>>, vector<8x8xf32>
    %cst_163 = arith.constant dense<0.000000e+00> : vector<8x8xf32>
    %183 = tpu.matmul %21, %182, %cst_163 {dimension_numbers = #tpu.dot_dimension_numbers<[1], [0], [0], [1], [0, 0, 1, 1], [], []>} : vector<8x8xf32>, vector<8x8xf32>, vector<8x8xf32> -> vector<8x8xf32>
    %184 = arith.addf %181, %183 : vector<8x8xf32>
    %c0_164 = arith.constant 0 : index
    %c0_165 = arith.constant 0 : index
    %185 = vector.load %arg59[%c0_164, %c0_165] : memref<1x8xf32, #tpu.memory_space<vmem>>, vector<1x8xf32>
    %186 = vector.broadcast %185 : vector<1x8xf32> to vector<8x8xf32>
    %187 = arith.addf %184, %186 : vector<8x8xf32>
    %cst_166 = arith.constant 0.000000e+00 : f32
    %188 = vector.broadcast %cst_166 : f32 to vector<8x8xf32>
    %189 = arith.maximumf %187, %188 : vector<8x8xf32>
    %c0_167 = arith.constant 0 : index
    %c0_168 = arith.constant 0 : index
    %190 = vector.load %arg60[%c0_167, %c0_168] : memref<1x8xf32, #tpu.memory_space<vmem>>, vector<1x8xf32>
    %191 = vector.broadcast %190 : vector<1x8xf32> to vector<8x8xf32>
    %192 = arith.mulf %189, %191 : vector<8x8xf32>
    %cst_169 = arith.constant dense<0.000000e+00> : vector<8xf32>
    %193 = vector.multi_reduction <add>, %192, %cst_169 [1] : vector<8x8xf32> to vector<8xf32>
    %194 = vector.shape_cast %193 : vector<8xf32> to vector<8x1xf32>
    %195 = vector.broadcast %179 : f32 to vector<8x1xf32>
    %196 = arith.addf %194, %195 : vector<8x1xf32>
    %197 = math.exp %196 : vector<8x1xf32>
    %c0_170 = arith.constant 0 : index
    %c3 = arith.constant 3 : index
    %198 = memref.load %arg64[%c0_170, %c3] : memref<1x4xf32, #tpu.memory_space<smem>>
    %c0_171 = arith.constant 0 : index
    %c0_172 = arith.constant 0 : index
    %199 = vector.load %arg61[%c0_171, %c0_172] : memref<16x8xf32, #tpu.memory_space<vmem>>, vector<8x8xf32>
    %cst_173 = arith.constant dense<0.000000e+00> : vector<8x8xf32>
    %200 = tpu.matmul %178, %199, %cst_173 {dimension_numbers = #tpu.dot_dimension_numbers<[1], [0], [0], [1], [0, 0, 1, 1], [], []>} : vector<8x8xf32>, vector<8x8xf32>, vector<8x8xf32> -> vector<8x8xf32>
    %c8_174 = arith.constant 8 : index
    %c0_175 = arith.constant 0 : index
    %201 = vector.load %arg61[%c8_174, %c0_175] : memref<16x8xf32, #tpu.memory_space<vmem>>, vector<8x8xf32>
    %cst_176 = arith.constant dense<0.000000e+00> : vector<8x8xf32>
    %202 = tpu.matmul %21, %201, %cst_176 {dimension_numbers = #tpu.dot_dimension_numbers<[1], [0], [0], [1], [0, 0, 1, 1], [], []>} : vector<8x8xf32>, vector<8x8xf32>, vector<8x8xf32> -> vector<8x8xf32>
    %203 = arith.addf %200, %202 : vector<8x8xf32>
    %c0_177 = arith.constant 0 : index
    %c0_178 = arith.constant 0 : index
    %204 = vector.load %arg62[%c0_177, %c0_178] : memref<1x8xf32, #tpu.memory_space<vmem>>, vector<1x8xf32>
    %205 = vector.broadcast %204 : vector<1x8xf32> to vector<8x8xf32>
    %206 = arith.addf %203, %205 : vector<8x8xf32>
    %cst_179 = arith.constant 0.000000e+00 : f32
    %207 = vector.broadcast %cst_179 : f32 to vector<8x8xf32>
    %208 = arith.maximumf %206, %207 : vector<8x8xf32>
    %c0_180 = arith.constant 0 : index
    %c0_181 = arith.constant 0 : index
    %209 = vector.load %arg63[%c0_180, %c0_181] : memref<1x8xf32, #tpu.memory_space<vmem>>, vector<1x8xf32>
    %210 = vector.broadcast %209 : vector<1x8xf32> to vector<8x8xf32>
    %211 = arith.mulf %208, %210 : vector<8x8xf32>
    %cst_182 = arith.constant dense<0.000000e+00> : vector<8xf32>
    %212 = vector.multi_reduction <add>, %211, %cst_182 [1] : vector<8x8xf32> to vector<8xf32>
    %213 = vector.shape_cast %212 : vector<8xf32> to vector<8x1xf32>
    %214 = vector.broadcast %198 : f32 to vector<8x1xf32>
    %215 = arith.addf %213, %214 : vector<8x1xf32>
    %216 = math.exp %215 : vector<8x1xf32>
    %217 = vector.broadcast %197 : vector<8x1xf32> to vector<8x8xf32>
    %218 = arith.mulf %217, %178 : vector<8x8xf32>
    %219 = vector.broadcast %216 : vector<8x1xf32> to vector<8x8xf32>
    %220 = arith.mulf %219, %21 : vector<8x8xf32>
    %221 = arith.addf %218, %220 : vector<8x8xf32>
    %c0_183 = arith.constant 0 : index
    %c0_184 = arith.constant 0 : index
    %222 = vector.load %arg44[%c0_183, %c0_184] : memref<8x16xf32, #tpu.memory_space<vmem>>, vector<8x16xf32>
    %cst_185 = arith.constant dense<0.000000e+00> : vector<8x16xf32>
    %223 = tpu.matmul %221, %222, %cst_185 {dimension_numbers = #tpu.dot_dimension_numbers<[1], [0], [0], [1], [0, 0, 1, 1], [], []>} : vector<8x8xf32>, vector<8x16xf32>, vector<8x16xf32> -> vector<8x16xf32>
    %c0_186 = arith.constant 0 : index
    %c0_187 = arith.constant 0 : index
    %224 = vector.load %arg45[%c0_186, %c0_187] : memref<1x16xf32, #tpu.memory_space<vmem>>, vector<1x16xf32>
    %225 = vector.broadcast %224 : vector<1x16xf32> to vector<8x16xf32>
    %226 = arith.addf %223, %225 : vector<8x16xf32>
    %cst_188 = arith.constant 0.000000e+00 : f32
    %227 = vector.broadcast %cst_188 : f32 to vector<8x16xf32>
    %228 = arith.maximumf %226, %227 : vector<8x16xf32>
    %c0_189 = arith.constant 0 : index
    %c0_190 = arith.constant 0 : index
    %229 = vector.load %arg46[%c0_189, %c0_190] : memref<16x8xf32, #tpu.memory_space<vmem>>, vector<16x8xf32>
    %cst_191 = arith.constant dense<0.000000e+00> : vector<8x8xf32>
    %230 = tpu.matmul %228, %229, %cst_191 {dimension_numbers = #tpu.dot_dimension_numbers<[1], [0], [0], [1], [0, 0, 1, 1], [], []>} : vector<8x16xf32>, vector<16x8xf32>, vector<8x8xf32> -> vector<8x8xf32>
    %c0_192 = arith.constant 0 : index
    %c0_193 = arith.constant 0 : index
    %231 = vector.load %arg47[%c0_192, %c0_193] : memref<1x8xf32, #tpu.memory_space<vmem>>, vector<1x8xf32>
    %232 = vector.broadcast %231 : vector<1x8xf32> to vector<8x8xf32>
    %233 = arith.addf %230, %232 : vector<8x8xf32>
    %c0_194 = arith.constant 0 : index
    %c0_195 = arith.constant 0 : index
    %234 = vector.load %arg48[%c0_194, %c0_195] : memref<8x16xf32, #tpu.memory_space<vmem>>, vector<8x16xf32>
    %cst_196 = arith.constant dense<0.000000e+00> : vector<8x16xf32>
    %235 = tpu.matmul %74, %234, %cst_196 {dimension_numbers = #tpu.dot_dimension_numbers<[1], [0], [0], [1], [0, 0, 1, 1], [], []>} : vector<8x8xf32>, vector<8x16xf32>, vector<8x16xf32> -> vector<8x16xf32>
    %c0_197 = arith.constant 0 : index
    %c0_198 = arith.constant 0 : index
    %236 = vector.load %arg49[%c0_197, %c0_198] : memref<1x16xf32, #tpu.memory_space<vmem>>, vector<1x16xf32>
    %237 = vector.broadcast %236 : vector<1x16xf32> to vector<8x16xf32>
    %238 = arith.addf %235, %237 : vector<8x16xf32>
    %cst_199 = arith.constant 0.000000e+00 : f32
    %239 = vector.broadcast %cst_199 : f32 to vector<8x16xf32>
    %240 = arith.maximumf %238, %239 : vector<8x16xf32>
    %c0_200 = arith.constant 0 : index
    %c0_201 = arith.constant 0 : index
    %241 = vector.load %arg50[%c0_200, %c0_201] : memref<16x8xf32, #tpu.memory_space<vmem>>, vector<16x8xf32>
    %cst_202 = arith.constant dense<0.000000e+00> : vector<8x8xf32>
    %242 = tpu.matmul %240, %241, %cst_202 {dimension_numbers = #tpu.dot_dimension_numbers<[1], [0], [0], [1], [0, 0, 1, 1], [], []>} : vector<8x16xf32>, vector<16x8xf32>, vector<8x8xf32> -> vector<8x8xf32>
    %c0_203 = arith.constant 0 : index
    %c0_204 = arith.constant 0 : index
    %243 = vector.load %arg51[%c0_203, %c0_204] : memref<1x8xf32, #tpu.memory_space<vmem>>, vector<1x8xf32>
    %244 = vector.broadcast %243 : vector<1x8xf32> to vector<8x8xf32>
    %245 = arith.addf %242, %244 : vector<8x8xf32>
    %246 = arith.mulf %233, %245 : vector<8x8xf32>
    %cst_205 = arith.constant dense<0.000000e+00> : vector<8xf32>
    %247 = vector.multi_reduction <add>, %246, %cst_205 [1] : vector<8x8xf32> to vector<8xf32>
    %248 = vector.shape_cast %247 : vector<8xf32> to vector<8x1xf32>
    %c0_206 = arith.constant 0 : index
    %c0_207 = arith.constant 0 : index
    %249 = vector.load %arg71[%c0_206, %c0_207] : memref<8x1xf32, #tpu.memory_space<vmem>>, vector<8x1xf32>
    tpu.vector_store %arg71[%c0_206, %c0_207], %248 {strides = array<i32>} : memref<8x1xf32, #tpu.memory_space<vmem>>, vector<8x1xf32>,
    return
  }
  func.func @transform_0(%arg0: i32) -> (i32, i32) {
    %c0_i32 = arith.constant 0 : i32
    %c0_i32_0 = arith.constant 0 : i32
    return %arg0, %c0_i32 : i32, i32
  }
  func.func @transform_1(%arg0: i32) -> (i32, i32) {
    %c0_i32 = arith.constant 0 : i32
    %c0_i32_0 = arith.constant 0 : i32
    return %arg0, %c0_i32 : i32, i32
  }
  func.func @transform_2(%arg0: i32) -> (i32, i32) {
    %c0_i32 = arith.constant 0 : i32
    %c0_i32_0 = arith.constant 0 : i32
    return %arg0, %c0_i32 : i32, i32
  }
  func.func @transform_3(%arg0: i32) -> (i32, i32) {
    %c0_i32 = arith.constant 0 : i32
    %c0_i32_0 = arith.constant 0 : i32
    %c0_i32_1 = arith.constant 0 : i32
    return %c0_i32, %c0_i32_0 : i32, i32
  }
  func.func @transform_4(%arg0: i32) -> (i32, i32) {
    %c0_i32 = arith.constant 0 : i32
    %c0_i32_0 = arith.constant 0 : i32
    %c0_i32_1 = arith.constant 0 : i32
    return %c0_i32, %c0_i32_0 : i32, i32
  }
  func.func @transform_5(%arg0: i32) -> (i32, i32) {
    %c0_i32 = arith.constant 0 : i32
    %c0_i32_0 = arith.constant 0 : i32
    %c0_i32_1 = arith.constant 0 : i32
    return %c0_i32, %c0_i32_0 : i32, i32
  }
  func.func @transform_6(%arg0: i32) -> (i32, i32) {
    %c0_i32 = arith.constant 0 : i32
    %c0_i32_0 = arith.constant 0 : i32
    %c0_i32_1 = arith.constant 0 : i32
    return %c0_i32, %c0_i32_0 : i32, i32
  }
  func.func @transform_7(%arg0: i32) -> (i32, i32) {
    %c0_i32 = arith.constant 0 : i32
    %c0_i32_0 = arith.constant 0 : i32
    %c0_i32_1 = arith.constant 0 : i32
    return %c0_i32, %c0_i32_0 : i32, i32
  }
  func.func @transform_8(%arg0: i32) -> (i32, i32) {
    %c0_i32 = arith.constant 0 : i32
    %c0_i32_0 = arith.constant 0 : i32
    %c0_i32_1 = arith.constant 0 : i32
    return %c0_i32, %c0_i32_0 : i32, i32
  }
  func.func @transform_9(%arg0: i32) -> (i32, i32) {
    %c0_i32 = arith.constant 0 : i32
    %c0_i32_0 = arith.constant 0 : i32
    %c0_i32_1 = arith.constant 0 : i32
    return %c0_i32, %c0_i32_0 : i32, i32
  }
  func.func @transform_10(%arg0: i32) -> (i32, i32) {
    %c0_i32 = arith.constant 0 : i32
    %c0_i32_0 = arith.constant 0 : i32
    %c0_i32_1 = arith.constant 0 : i32
    return %c0_i32, %c0_i32_0 : i32, i32
  }
  func.func @transform_11(%arg0: i32) -> (i32, i32) {
    %c0_i32 = arith.constant 0 : i32
    %c0_i32_0 = arith.constant 0 : i32
    %c0_i32_1 = arith.constant 0 : i32
    return %c0_i32, %c0_i32_0 : i32, i32
  }
  func.func @transform_12(%arg0: i32) -> (i32, i32) {
    %c0_i32 = arith.constant 0 : i32
    %c0_i32_0 = arith.constant 0 : i32
    %c0_i32_1 = arith.constant 0 : i32
    return %c0_i32, %c0_i32_0 : i32, i32
  }
  func.func @transform_13(%arg0: i32) -> (i32, i32) {
    %c0_i32 = arith.constant 0 : i32
    %c0_i32_0 = arith.constant 0 : i32
    %c0_i32_1 = arith.constant 0 : i32
    return %c0_i32, %c0_i32_0 : i32, i32
  }
  func.func @transform_14(%arg0: i32) -> (i32, i32) {
    %c0_i32 = arith.constant 0 : i32
    %c0_i32_0 = arith.constant 0 : i32
    %c0_i32_1 = arith.constant 0 : i32
    return %c0_i32, %c0_i32_0 : i32, i32
  }
  func.func @transform_15(%arg0: i32) -> (i32, i32) {
    %c0_i32 = arith.constant 0 : i32
    %c0_i32_0 = arith.constant 0 : i32
    %c0_i32_1 = arith.constant 0 : i32
    return %c0_i32, %c0_i32_0 : i32, i32
  }
  func.func @transform_16(%arg0: i32) -> (i32, i32) {
    %c0_i32 = arith.constant 0 : i32
    %c0_i32_0 = arith.constant 0 : i32
    %c0_i32_1 = arith.constant 0 : i32
    return %c0_i32, %c0_i32_0 : i32, i32
  }
  func.func @transform_17(%arg0: i32) -> (i32, i32) {
    %c0_i32 = arith.constant 0 : i32
    %c0_i32_0 = arith.constant 0 : i32
    %c0_i32_1 = arith.constant 0 : i32
    return %c0_i32, %c0_i32_0 : i32, i32
  }
  func.func @transform_18(%arg0: i32) -> (i32, i32) {
    %c0_i32 = arith.constant 0 : i32
    %c0_i32_0 = arith.constant 0 : i32
    %c0_i32_1 = arith.constant 0 : i32
    return %c0_i32, %c0_i32_0 : i32, i32
  }
  func.func @transform_19(%arg0: i32) -> (i32, i32) {
    %c0_i32 = arith.constant 0 : i32
    %c0_i32_0 = arith.constant 0 : i32
    %c0_i32_1 = arith.constant 0 : i32
    return %c0_i32, %c0_i32_0 : i32, i32
  }
  func.func @transform_20(%arg0: i32) -> (i32, i32) {
    %c0_i32 = arith.constant 0 : i32
    %c0_i32_0 = arith.constant 0 : i32
    %c0_i32_1 = arith.constant 0 : i32
    return %c0_i32, %c0_i32_0 : i32, i32
  }
  func.func @transform_21(%arg0: i32) -> (i32, i32) {
    %c0_i32 = arith.constant 0 : i32
    %c0_i32_0 = arith.constant 0 : i32
    %c0_i32_1 = arith.constant 0 : i32
    return %c0_i32, %c0_i32_0 : i32, i32
  }
  func.func @transform_22(%arg0: i32) -> (i32, i32) {
    %c0_i32 = arith.constant 0 : i32
    %c0_i32_0 = arith.constant 0 : i32
    %c0_i32_1 = arith.constant 0 : i32
    return %c0_i32, %c0_i32_0 : i32, i32
  }
  func.func @transform_23(%arg0: i32) -> (i32, i32) {
    %c0_i32 = arith.constant 0 : i32
    %c0_i32_0 = arith.constant 0 : i32
    %c0_i32_1 = arith.constant 0 : i32
    return %c0_i32, %c0_i32_0 : i32, i32
  }
  func.func @transform_24(%arg0: i32) -> (i32, i32) {
    %c0_i32 = arith.constant 0 : i32
    %c0_i32_0 = arith.constant 0 : i32
    %c0_i32_1 = arith.constant 0 : i32
    return %c0_i32, %c0_i32_0 : i32, i32
  }
  func.func @transform_25(%arg0: i32) -> (i32, i32) {
    %c0_i32 = arith.constant 0 : i32
    %c0_i32_0 = arith.constant 0 : i32
    %c0_i32_1 = arith.constant 0 : i32
    return %c0_i32, %c0_i32_0 : i32, i32
  }
  func.func @transform_26(%arg0: i32) -> (i32, i32) {
    %c0_i32 = arith.constant 0 : i32
    %c0_i32_0 = arith.constant 0 : i32
    %c0_i32_1 = arith.constant 0 : i32
    return %c0_i32, %c0_i32_0 : i32, i32
  }
  func.func @transform_27(%arg0: i32) -> (i32, i32) {
    %c0_i32 = arith.constant 0 : i32
    %c0_i32_0 = arith.constant 0 : i32
    %c0_i32_1 = arith.constant 0 : i32
    return %c0_i32, %c0_i32_0 : i32, i32
  }
  func.func @transform_28(%arg0: i32) -> (i32, i32) {
    %c0_i32 = arith.constant 0 : i32
    %c0_i32_0 = arith.constant 0 : i32
    %c0_i32_1 = arith.constant 0 : i32
    return %c0_i32, %c0_i32_0 : i32, i32
  }
  func.func @transform_29(%arg0: i32) -> (i32, i32) {
    %c0_i32 = arith.constant 0 : i32
    %c0_i32_0 = arith.constant 0 : i32
    %c0_i32_1 = arith.constant 0 : i32
    return %c0_i32, %c0_i32_0 : i32, i32
  }
  func.func @transform_30(%arg0: i32) -> (i32, i32) {
    %c0_i32 = arith.constant 0 : i32
    %c0_i32_0 = arith.constant 0 : i32
    %c0_i32_1 = arith.constant 0 : i32
    return %c0_i32, %c0_i32_0 : i32, i32
  }
  func.func @transform_31(%arg0: i32) -> (i32, i32) {
    %c0_i32 = arith.constant 0 : i32
    %c0_i32_0 = arith.constant 0 : i32
    %c0_i32_1 = arith.constant 0 : i32
    return %c0_i32, %c0_i32_0 : i32, i32
  }
  func.func @transform_32(%arg0: i32) -> (i32, i32) {
    %c0_i32 = arith.constant 0 : i32
    %c0_i32_0 = arith.constant 0 : i32
    %c0_i32_1 = arith.constant 0 : i32
    return %c0_i32, %c0_i32_0 : i32, i32
  }
  func.func @transform_33(%arg0: i32) -> (i32, i32) {
    %c0_i32 = arith.constant 0 : i32
    %c0_i32_0 = arith.constant 0 : i32
    %c0_i32_1 = arith.constant 0 : i32
    return %c0_i32, %c0_i32_0 : i32, i32
  }
  func.func @transform_34(%arg0: i32) -> (i32, i32) {
    %c0_i32 = arith.constant 0 : i32
    %c0_i32_0 = arith.constant 0 : i32
    %c0_i32_1 = arith.constant 0 : i32
    return %c0_i32, %c0_i32_0 : i32, i32
  }
  func.func @transform_35(%arg0: i32) -> (i32, i32) {
    %c0_i32 = arith.constant 0 : i32
    %c0_i32_0 = arith.constant 0 : i32
    %c0_i32_1 = arith.constant 0 : i32
    return %c0_i32, %c0_i32_0 : i32, i32
  }
  func.func @transform_36(%arg0: i32) -> (i32, i32) {
    %c0_i32 = arith.constant 0 : i32
    %c0_i32_0 = arith.constant 0 : i32
    %c0_i32_1 = arith.constant 0 : i32
    return %c0_i32, %c0_i32_0 : i32, i32
  }
  func.func @transform_37(%arg0: i32) -> (i32, i32) {
    %c0_i32 = arith.constant 0 : i32
    %c0_i32_0 = arith.constant 0 : i32
    %c0_i32_1 = arith.constant 0 : i32
    return %c0_i32, %c0_i32_0 : i32, i32
  }
  func.func @transform_38(%arg0: i32) -> (i32, i32) {
    %c0_i32 = arith.constant 0 : i32
    %c0_i32_0 = arith.constant 0 : i32
    %c0_i32_1 = arith.constant 0 : i32
    return %c0_i32, %c0_i32_0 : i32, i32
  }
  func.func @transform_39(%arg0: i32) -> (i32, i32) {
    %c0_i32 = arith.constant 0 : i32
    %c0_i32_0 = arith.constant 0 : i32
    %c0_i32_1 = arith.constant 0 : i32
    return %c0_i32, %c0_i32_0 : i32, i32
  }
  func.func @transform_40(%arg0: i32) -> (i32, i32) {
    %c0_i32 = arith.constant 0 : i32
    %c0_i32_0 = arith.constant 0 : i32
    %c0_i32_1 = arith.constant 0 : i32
    return %c0_i32, %c0_i32_0 : i32, i32
  }
  func.func @transform_41(%arg0: i32) -> (i32, i32) {
    %c0_i32 = arith.constant 0 : i32
    %c0_i32_0 = arith.constant 0 : i32
    %c0_i32_1 = arith.constant 0 : i32
    return %c0_i32, %c0_i32_0 : i32, i32
  }
  func.func @transform_42(%arg0: i32) -> (i32, i32) {
    %c0_i32 = arith.constant 0 : i32
    %c0_i32_0 = arith.constant 0 : i32
    %c0_i32_1 = arith.constant 0 : i32
    return %c0_i32, %c0_i32_0 : i32, i32
  }
  func.func @transform_43(%arg0: i32) -> (i32, i32) {
    %c0_i32 = arith.constant 0 : i32
    %c0_i32_0 = arith.constant 0 : i32
    %c0_i32_1 = arith.constant 0 : i32
    return %c0_i32, %c0_i32_0 : i32, i32
  }
  func.func @transform_44(%arg0: i32) -> (i32, i32) {
    %c0_i32 = arith.constant 0 : i32
    %c0_i32_0 = arith.constant 0 : i32
    %c0_i32_1 = arith.constant 0 : i32
    return %c0_i32, %c0_i32_0 : i32, i32
  }
  func.func @transform_45(%arg0: i32) -> (i32, i32) {
    %c0_i32 = arith.constant 0 : i32
    %c0_i32_0 = arith.constant 0 : i32
    %c0_i32_1 = arith.constant 0 : i32
    return %c0_i32, %c0_i32_0 : i32, i32
  }
  func.func @transform_46(%arg0: i32) -> (i32, i32) {
    %c0_i32 = arith.constant 0 : i32
    %c0_i32_0 = arith.constant 0 : i32
    %c0_i32_1 = arith.constant 0 : i32
    return %c0_i32, %c0_i32_0 : i32, i32
  }
  func.func @transform_47(%arg0: i32) -> (i32, i32) {
    %c0_i32 = arith.constant 0 : i32
    %c0_i32_0 = arith.constant 0 : i32
    %c0_i32_1 = arith.constant 0 : i32
    return %c0_i32, %c0_i32_0 : i32, i32
  }
  func.func @transform_48(%arg0: i32) -> (i32, i32) {
    %c0_i32 = arith.constant 0 : i32
    %c0_i32_0 = arith.constant 0 : i32
    %c0_i32_1 = arith.constant 0 : i32
    return %c0_i32, %c0_i32_0 : i32, i32
  }
  func.func @transform_49(%arg0: i32) -> (i32, i32) {
    %c0_i32 = arith.constant 0 : i32
    %c0_i32_0 = arith.constant 0 : i32
    %c0_i32_1 = arith.constant 0 : i32
    return %c0_i32, %c0_i32_0 : i32, i32
  }
  func.func @transform_50(%arg0: i32) -> (i32, i32) {
    %c0_i32 = arith.constant 0 : i32
    %c0_i32_0 = arith.constant 0 : i32
    %c0_i32_1 = arith.constant 0 : i32
    return %c0_i32, %c0_i32_0 : i32, i32
  }
  func.func @transform_51(%arg0: i32) -> (i32, i32) {
    %c0_i32 = arith.constant 0 : i32
    %c0_i32_0 = arith.constant 0 : i32
    %c0_i32_1 = arith.constant 0 : i32
    return %c0_i32, %c0_i32_0 : i32, i32
  }
  func.func @transform_52(%arg0: i32) -> (i32, i32) {
    %c0_i32 = arith.constant 0 : i32
    %c0_i32_0 = arith.constant 0 : i32
    %c0_i32_1 = arith.constant 0 : i32
    return %c0_i32, %c0_i32_0 : i32, i32
  }
  func.func @transform_53(%arg0: i32) -> (i32, i32) {
    %c0_i32 = arith.constant 0 : i32
    %c0_i32_0 = arith.constant 0 : i32
    %c0_i32_1 = arith.constant 0 : i32
    return %c0_i32, %c0_i32_0 : i32, i32
  }
  func.func @transform_54(%arg0: i32) -> (i32, i32) {
    %c0_i32 = arith.constant 0 : i32
    %c0_i32_0 = arith.constant 0 : i32
    %c0_i32_1 = arith.constant 0 : i32
    return %c0_i32, %c0_i32_0 : i32, i32
  }
  func.func @transform_55(%arg0: i32) -> (i32, i32) {
    %c0_i32 = arith.constant 0 : i32
    %c0_i32_0 = arith.constant 0 : i32
    %c0_i32_1 = arith.constant 0 : i32
    return %c0_i32, %c0_i32_0 : i32, i32
  }
  func.func @transform_56(%arg0: i32) -> (i32, i32) {
    %c0_i32 = arith.constant 0 : i32
    %c0_i32_0 = arith.constant 0 : i32
    %c0_i32_1 = arith.constant 0 : i32
    return %c0_i32, %c0_i32_0 : i32, i32
  }
  func.func @transform_57(%arg0: i32) -> (i32, i32) {
    %c0_i32 = arith.constant 0 : i32
    %c0_i32_0 = arith.constant 0 : i32
    %c0_i32_1 = arith.constant 0 : i32
    return %c0_i32, %c0_i32_0 : i32, i32
  }
  func.func @transform_58(%arg0: i32) -> (i32, i32) {
    %c0_i32 = arith.constant 0 : i32
    %c0_i32_0 = arith.constant 0 : i32
    %c0_i32_1 = arith.constant 0 : i32
    return %c0_i32, %c0_i32_0 : i32, i32
  }
  func.func @transform_59(%arg0: i32) -> (i32, i32) {
    %c0_i32 = arith.constant 0 : i32
    %c0_i32_0 = arith.constant 0 : i32
    %c0_i32_1 = arith.constant 0 : i32
    return %c0_i32, %c0_i32_0 : i32, i32
  }
  func.func @transform_60(%arg0: i32) -> (i32, i32) {
    %c0_i32 = arith.constant 0 : i32
    %c0_i32_0 = arith.constant 0 : i32
    %c0_i32_1 = arith.constant 0 : i32
    return %c0_i32, %c0_i32_0 : i32, i32
  }
  func.func @transform_61(%arg0: i32) -> (i32, i32) {
    %c0_i32 = arith.constant 0 : i32
    %c0_i32_0 = arith.constant 0 : i32
    %c0_i32_1 = arith.constant 0 : i32
    return %c0_i32, %c0_i32_0 : i32, i32
  }
  func.func @transform_62(%arg0: i32) -> (i32, i32) {
    %c0_i32 = arith.constant 0 : i32
    %c0_i32_0 = arith.constant 0 : i32
    %c0_i32_1 = arith.constant 0 : i32
    return %c0_i32, %c0_i32_0 : i32, i32
  }
  func.func @transform_63(%arg0: i32) -> (i32, i32) {
    %c0_i32 = arith.constant 0 : i32
    %c0_i32_0 = arith.constant 0 : i32
    %c0_i32_1 = arith.constant 0 : i32
    return %c0_i32, %c0_i32_0 : i32, i32
  }
  func.func @transform_64(%arg0: i32) -> (i32, i32) {
    %c0_i32 = arith.constant 0 : i32
    %c0_i32_0 = arith.constant 0 : i32
    return %arg0, %c0_i32 : i32, i32
  }
  func.func @transform_65(%arg0: i32) -> (i32, i32) {
    %c0_i32 = arith.constant 0 : i32
    %c0_i32_0 = arith.constant 0 : i32
    return %arg0, %c0_i32 : i32, i32
  }
  func.func @transform_66(%arg0: i32) -> (i32, i32) {
    %c0_i32 = arith.constant 0 : i32
    %c0_i32_0 = arith.constant 0 : i32
    return %arg0, %c0_i32 : i32, i32
  }
  func.func @transform_67(%arg0: i32) -> (i32, i32) {
    %c0_i32 = arith.constant 0 : i32
    %c0_i32_0 = arith.constant 0 : i32
    return %arg0, %c0_i32 : i32, i32
  }
  func.func @transform_68(%arg0: i32) -> (i32, i32) {
    %c0_i32 = arith.constant 0 : i32
    %c0_i32_0 = arith.constant 0 : i32
    return %arg0, %c0_i32 : i32, i32
  }
  func.func @transform_69(%arg0: i32) -> (i32, i32) {
    %c0_i32 = arith.constant 0 : i32
    %c0_i32_0 = arith.constant 0 : i32
    return %arg0, %c0_i32 : i32, i32
  }
  func.func @transform_70(%arg0: i32) -> (i32, i32) {
    %c0_i32 = arith.constant 0 : i32
    %c0_i32_0 = arith.constant 0 : i32
    return %arg0, %c0_i32 : i32, i32
  }
}

</mosaic_0001>

<bundles_post_ra>
// kernel: tpu_custom_call.1
= control target key start
LH: loop header
LB: loop body
LE: loop exit
PB: predicated region body
PF: predicated region fallthrough
CT: control target
= control target key end

     0   :  { %s4283_s6 = smov 1   ;;  %s4284_s10 = smov 2   ;;  %s5086_s0 = inlined_call_operand.smem [shape: u32[71], index: -1, kind: input, shape index: {}] }
   0x1   :  { %s4378_s5 = sld [smem:[%s5086_s0]]   ;;  %s4285_s14 = smov 3  }
   0x2   :  { %s4383_s9 = sld [smem:[%s5086_s0 + %s4283_s6]]   ;;  %s4286_s18 = smov 4  }
   0x3   :  { %s4388_s13 = sld [smem:[%s5086_s0 + %s4284_s10]]   ;;  %s4287_s22 = smov 5  }
   0x4   :  { %s4393_s17 = sld [smem:[%s5086_s0 + %s4285_s14]]   ;;  %s4288_s26 = smov 6  }
   0x5   :  { %s4398_s21 = sld [smem:[%s5086_s0 + %s4286_s18]]   ;;  %s4289_s30 = smov 7  }
   0x6   :  { %s4403_s25 = sld [smem:[%s5086_s0 + %s4287_s22]]   ;;  %s4290_s4 = smov 8  }
   0x7   :  { %s4408_s29 = sld [smem:[%s5086_s0 + %s4288_s26]]   ;;  %s4291_s10 = smov 9  }
   0x8   :  { %5108 = sst [smem:[#allocation34_spill]] %s4383_s9  ;;  %s4292_s15 = smov 10  }
   0x9   :  { %5109 = sst [smem:[#allocation35_spill]] %s4388_s13  ;;  %s4293_s20 = smov 11  }
   0xa   :  { %s4413_s3 = sld [smem:[%s5086_s0 + %s4289_s30]]   ;;  %s4294_s26 = smov 12  }
   0xb   :  { %s4418_s8 = sld [smem:[%s5086_s0 + %s4290_s4]]   ;;  %s4295_s1 = smov 13  }
   0xc   :  { %s4423_s14 = sld [smem:[%s5086_s0 + %s4291_s10]]   ;;  %s4296_s7 = smov 14  }
   0xd   :  { %5110 = sst [smem:[#allocation36_spill]] %s4408_s29  ;;  %s4298_s22 = smov 16  }
   0xe   :  { %s4428_s19 = sld [smem:[%s5086_s0 + %s4292_s15]]   ;;  %s4297_s15 = smov 15  }
   0xf   :  { %s4433_s24 = sld [smem:[%s5086_s0 + %s4293_s20]]   ;;  %s4299_s28 = smov 17  }
  0x10   :  { %s4438_s30 = sld [smem:[%s5086_s0 + %s4294_s26]]  }
  0x11   :  { %5111 = sst [smem:[#allocation37_spill]] %s4418_s8 }
  0x12   :  { %5112 = sst [smem:[#allocation38_spill]] %s4423_s14 }
  0x13   :  { %s4443_s6 = sld [smem:[%s5086_s0 + %s4295_s1]]  }
  0x14   :  { %5113 = sst [smem:[#allocation39_spill]] %s4428_s19 }
  0x15   :  { %5114 = sst [smem:[#allocation40_spill]] %s4433_s24 }
  0x16   :  { %5115 = sst [smem:[#allocation41_spill]] %s4438_s30 }
  0x17   :  { %s4448_s12 = sld [smem:[%s5086_s0 + %s4296_s7]]   ;;  %s4300_s7 = smov 18  }
  0x18   :  { %s4453_s20 = sld [smem:[%s5086_s0 + %s4297_s15]]   ;;  %s4301_s15 = smov 19  }
  0x19   :  { %5116 = sst [smem:[#allocation42_spill]] %s4443_s6 }
  0x1a   :  { %s4458_s27 = sld [smem:[%s5086_s0 + %s4298_s22]]   ;;  %s4302_s22 = smov 20  }
  0x1b   :  { %s4463_s4 = sld [smem:[%s5086_s0 + %s4299_s28]]   ;;  %s4303_s28 = smov 21  }
  0x1c   :  { %s4468_s13 = sld [smem:[%s5086_s0 + %s4300_s7]]   ;;  %s4304_s7 = smov 22  }
  0x1d   :  { %5117 = sst [smem:[#allocation43_spill]] %s4448_s12 }
  0x1e   :  { %5118 = sst [smem:[#allocation44_spill]] %s4453_s20 }
  0x1f   :  { %s4473_s9 = sld [smem:[%s5086_s0 + %s4301_s15]]   ;;  %s4305_s15 = smov 23  }
  0x20   :  { %5119 = sst [smem:[#allocation45_spill]] %s4458_s27 }
  0x21   :  { %5120 = sst [smem:[#allocation46_spill]] %s4463_s4 }
  0x22   :  { %5121 = sst [smem:[#allocation47_spill]] %s4468_s13 }
  0x23   :  { %s4478_s27 = sld [smem:[%s5086_s0 + %s4302_s22]]   ;;  %s4306_s22 = smov 24  }
  0x24   :  { %s4483_s30 = sld [smem:[%s5086_s0 + %s4303_s28]]   ;;  %s4307_s28 = smov 25  }
  0x25   :  { %5122 = sst [smem:[#allocation48_spill]] %s4473_s9 }
  0x26   :  { %s4488_s13 = sld [smem:[%s5086_s0 + %s4304_s7]]   ;;  %s4308_s7 = smov 26  }
  0x27   :  { %s4493_s9 = sld [smem:[%s5086_s0 + %s4305_s15]]   ;;  %s4309_s15 = smov 27  }
  0x29   :  { %5123 = sst [smem:[#allocation49_spill]] %s4478_s27 }
  0x2a   :  { %5124 = sst [smem:[#allocation50_spill]] %s4483_s30 }
  0x2b   :  { %s4498_s27 = sld [smem:[%s5086_s0 + %s4306_s22]]   ;;  %s4310_s22 = smov 28  }
  0x2c   :  { %5125 = sst [smem:[#allocation51_spill]] %s4488_s13 }
  0x2d   :  { %5126 = sst [smem:[#allocation52_spill]] %s4493_s9 }
  0x2e   :  { %s4503_s30 = sld [smem:[%s5086_s0 + %s4307_s28]]   ;;  %s4311_s28 = smov 29  }
  0x2f   :  { %s4508_s13 = sld [smem:[%s5086_s0 + %s4308_s7]]   ;;  %s4312_s7 = smov 30  }
  0x30   :  { %s4513_s9 = sld [smem:[%s5086_s0 + %s4309_s15]]   ;;  %s4313_s15 = smov 31  }
  0x31   :  { %5127 = sst [smem:[#allocation53_spill]] %s4498_s27 }
  0x32   :  { %s4518_s27 = sld [smem:[%s5086_s0 + %s4310_s22]]   ;;  %s4314_s22 = smov 32  }
  0x34   :  { %5128 = sst [smem:[#allocation54_spill]] %s4503_s30 }
  0x35   :  { %5129 = sst [smem:[#allocation55_spill]] %s4508_s13 }
  0x36   :  { %5130 = sst [smem:[#allocation56_spill]] %s4513_s9 }
  0x37   :  { %s4523_s30 = sld [smem:[%s5086_s0 + %s4311_s28]]   ;;  %s4315_s28 = smov 33  }
  0x38   :  { %5131 = sst [smem:[#allocation57_spill]] %s4518_s27 }
  0x39   :  { %s4528_s13 = sld [smem:[%s5086_s0 + %s4312_s7]]   ;;  %s4316_s7 = smov 34  }
  0x3a   :  { %s4533_s9 = sld [smem:[%s5086_s0 + %s4313_s15]]   ;;  %s4317_s15 = smov 35  }
  0x3b   :  { %s4538_s27 = sld [smem:[%s5086_s0 + %s4314_s22]]   ;;  %s4318_s22 = smov 36  }
  0x3d   :  { %5132 = sst [smem:[#allocation58_spill]] %s4523_s30 }
  0x3e   :  { %s4543_s30 = sld [smem:[%s5086_s0 + %s4315_s28]]   ;;  %s4319_s28 = smov 37  }
  0x3f   :  { %5133 = sst [smem:[#allocation59_spill]] %s4528_s13 }
  0x40   :  { %5134 = sst [smem:[#allocation60_spill]] %s4533_s9 }
  0x41   :  { %5135 = sst [smem:[#allocation61_spill]] %s4538_s27 }
  0x42   :  { %s4548_s13 = sld [smem:[%s5086_s0 + %s4316_s7]]   ;;  %s4320_s7 = smov 38  }
  0x43   :  { %s4553_s9 = sld [smem:[%s5086_s0 + %s4317_s15]]   ;;  %s4321_s15 = smov 39  }
  0x44   :  { %5136 = sst [smem:[#allocation62_spill]] %s4543_s30 }
  0x45   :  { %s4558_s27 = sld [smem:[%s5086_s0 + %s4318_s22]]   ;;  %s4322_s22 = smov 40  }
  0x46   :  { %s4563_s30 = sld [smem:[%s5086_s0 + %s4319_s28]]   ;;  %s4323_s28 = smov 41  }
  0x48   :  { %5137 = sst [smem:[#allocation63_spill]] %s4548_s13 }
  0x49   :  { %5138 = sst [smem:[#allocation64_spill]] %s4553_s9 }
  0x4a   :  { %s4568_s13 = sld [smem:[%s5086_s0 + %s4320_s7]]   ;;  %s4324_s7 = smov 42  }
  0x4b   :  { %5139 = sst [smem:[#allocation65_spill]] %s4558_s27 }
  0x4c   :  { %5140 = sst [smem:[#allocation66_spill]] %s4563_s30 }
  0x4d   :  { %s4573_s9 = sld [smem:[%s5086_s0 + %s4321_s15]]   ;;  %s4325_s15 = smov 43  }
  0x4e   :  { %s4578_s27 = sld [smem:[%s5086_s0 + %s4322_s22]]   ;;  %s4326_s22 = smov 44  }
  0x4f   :  { %s4583_s30 = sld [smem:[%s5086_s0 + %s4323_s28]]   ;;  %s4327_s28 = smov 45  }
  0x50   :  { %5141 = sst [smem:[#allocation67_spill]] %s4568_s13 }
  0x51   :  { %s4588_s13 = sld [smem:[%s5086_s0 + %s4324_s7]]   ;;  %s4328_s7 = smov 46  }
  0x53   :  { %5142 = sst [smem:[#allocation68_spill]] %s4573_s9 }
  0x54   :  { %5143 = sst [smem:[#allocation69_spill]] %s4578_s27 }
  0x55   :  { %5144 = sst [smem:[#allocation70_spill]] %s4583_s30 }
  0x56   :  { %s4593_s9 = sld [smem:[%s5086_s0 + %s4325_s15]]   ;;  %s4329_s15 = smov 47  }
  0x57   :  { %5145 = sst [smem:[#allocation71_spill]] %s4588_s13 }
  0x58   :  { %s4598_s27 = sld [smem:[%s5086_s0 + %s4326_s22]]   ;;  %s4330_s22 = smov 48  }
  0x59   :  { %s4603_s30 = sld [smem:[%s5086_s0 + %s4327_s28]]   ;;  %s4331_s28 = smov 49  }
  0x5a   :  { %s4608_s13 = sld [smem:[%s5086_s0 + %s4328_s7]]   ;;  %s4332_s7 = smov 50  }
  0x5c   :  { %5146 = sst [smem:[#allocation72_spill]] %s4593_s9 }
  0x5d   :  { %s4613_s9 = sld [smem:[%s5086_s0 + %s4329_s15]]   ;;  %s4333_s15 = smov 51  }
  0x5e   :  { %5147 = sst [smem:[#allocation73_spill]] %s4598_s27 }
  0x5f   :  { %5148 = sst [smem:[#allocation74_spill]] %s4603_s30 }
  0x60   :  { %5149 = sst [smem:[#allocation75_spill]] %s4608_s13 }
  0x61   :  { %s4618_s27 = sld [smem:[%s5086_s0 + %s4330_s22]]   ;;  %s4334_s22 = smov 52  }
  0x62   :  { %s4623_s30 = sld [smem:[%s5086_s0 + %s4331_s28]]   ;;  %s4335_s28 = smov 53  }
  0x63   :  { %5150 = sst [smem:[#allocation76_spill]] %s4613_s9 }
  0x64   :  { %s4628_s13 = sld [smem:[%s5086_s0 + %s4332_s7]]   ;;  %s4336_s7 = smov 54  }
  0x65   :  { %s4633_s9 = sld [smem:[%s5086_s0 + %s4333_s15]]   ;;  %s4337_s15 = smov 55  }
  0x67   :  { %5151 = sst [smem:[#allocation77_spill]] %s4618_s27 }
  0x68   :  { %5152 = sst [smem:[#allocation78_spill]] %s4623_s30 }
  0x69   :  { %s4638_s27 = sld [smem:[%s5086_s0 + %s4334_s22]]   ;;  %s4338_s22 = smov 56  }
  0x6a   :  { %5153 = sst [smem:[#allocation79_spill]] %s4628_s13 }
  0x6b   :  { %5154 = sst [smem:[#allocation80_spill]] %s4633_s9 }
  0x6c   :  { %s4643_s30 = sld [smem:[%s5086_s0 + %s4335_s28]]   ;;  %s4339_s28 = smov 57  }
  0x6d   :  { %s4648_s13 = sld [smem:[%s5086_s0 + %s4336_s7]]   ;;  %s4340_s7 = smov 58  }
  0x6e   :  { %s4653_s9 = sld [smem:[%s5086_s0 + %s4337_s15]]   ;;  %s4341_s15 = smov 59  }
  0x6f   :  { %s4658_s4 = sld [smem:[%s5086_s0 + %s4338_s22]]   ;;  %s4342_s22 = smov 60  }
  0x70   :  { %s4663_s12 = sld [smem:[%s5086_s0 + %s4339_s28]]   ;;  %s4343_s28 = smov 61  }
  0x71   :  { %s4673_s20 = sld [smem:[%s5086_s0 + %s4341_s15]]   ;;  %s4345_s15 = smov 63  }
  0x72   :  { %s4678_s19 = sld [smem:[%s5086_s0 + %s4342_s22]]   ;;  %s4346_s22 = smov 64  }
  0x73   :  { %5155 = sst [smem:[#allocation81_spill]] %s4648_s13 }
  0x74   :  { %s4668_s13 = sld [smem:[%s5086_s0 + %s4340_s7]]   ;;  %s4344_s7 = smov 62  }
  0x75   :  { %s4688_s24 = sld [smem:[%s5086_s0 + %s4344_s7]]   ;;  %s4348_s7 = smov 66  }
  0x76   :  { %5156 = sst [smem:[#allocation82_spill]] %s4663_s12 }
  0x77   :  { %s4683_s12 = sld [smem:[%s5086_s0 + %s4343_s28]]   ;;  %s4347_s28 = smov 65  }
  0x78   :  { %5157 = sst [smem:[#allocation83_spill]] %s4678_s19 }
  0x79   :  { %s4693_s8 = sld [smem:[%s5086_s0 + %s4345_s15]]   ;;  %s4349_s15 = smov 67  }
  0x7a   :  { %s4698_s19 = sld [smem:[%s5086_s0 + %s4346_s22]]   ;;  %s4350_s22 = smov 68  }
  0x7b   :  { %s4703_s6 = sld [smem:[%s5086_s0 + %s4347_s28]]   ;;  %s4351_s28 = smov 69  }
  0x7c   :  { %s4708_s14 = sld [smem:[%s5086_s0 + %s4348_s7]]   ;;  %s4352_s7 = smov 70  }
  0x7d   :  { %s4713_s29 = sld [smem:[%s5086_s0 + %s4349_s15]]  }
  0x80   :  { %5158 = sst [smem:[#allocation84_spill]] %s4698_s19 }
  0x81   :  { %5159 = sst [smem:[#allocation85_spill]] %s4703_s6 }
  0x82   :  { %5160 = sst [smem:[#allocation86_spill]] %s4708_s14 }
  0x83   :  { %s4718_s19 = sld [smem:[%s5086_s0 + %s4350_s22]]  }
  0x84   :  { %s4723_s6 = sld [smem:[%s5086_s0 + %s4351_s28]]  }
  0x85   :  { %s4728_s14 = sld [smem:[%s5086_s0 + %s4352_s7]]  }
  0x86   :  { %147 = vsyncpa [#allocation3], 0 }
  0x87   :  { %148 = vsyncpa [#allocation7], 0 }
  0x88   :  { %149 = vsyncpa [#allocation10], 0 }
  0x89   :  { %150 = vsyncpa [#allocation13], 0 }
  0x8a   :  { %151 = vsyncpa [#allocation16], 0 }
  0x8b   :  { %152 = vsyncpa [#allocation5], 0 }
  0x8c   :  { %153 = vsyncpa [#allocation4], 0 }
  0x8d   :  { %154 = vsyncpa [#allocation20], 0 }
  0x8e   :  { %155 = vsyncpa [#allocation23], 0  ;;  %s4353_s15 = smov [#allocation6]   ;;  %s4354_s18 = smov [#allocation9]  }
  0x8f   :  { %s276_s16 = sshll.u32 %s4353_s15, 4  ;;  %s298_s22 = sshll.u32 %s4354_s18, 4  ;;  %s277_s16 = int_to_ptr.vmem [resolvable:$true] %s276_s16  ;;  %s299_s22 = int_to_ptr.vmem [resolvable:$true] %s298_s22 }
  0x90   :  { %s3969_s0 = scalar_lea.hbm %s4643_s30, 16 }
  0x91   :  { %p3970_p0 = scmp.ne.s32.totalorder %s4643_s30, %s3969_s0  ;;  %p3973_p1 = scmp.lt.u32.totalorder %s3969_s0, %s4643_s30 }
  0x93   :  { %p3975_p2 = pnand %p3973_p1, %p3970_p0 }
  0x95   :  { %3978 = shalt.err (!%p3975_p2)
}
  0x96   :  { %s3979_s23 = scalar_lea.vmem %s277_s16, 16  ;;  %s3983_s26 = scalar_lea.vmem %s277_s16, 32 }
  0x97   :  { %p3980_p3 = scmp.ne.s32.totalorder %s277_s16, %s3979_s23  ;;  %p3984_p4 = scmp.lt.s32.totalorder %s277_s16, %s277_s16 }
  0x98   :  { %p3985_p5 = scmp.lt.s32.totalorder %s3983_s26, %s3979_s23 }
  0x9a   :  { %p3986_p6 = por %p3985_p5, %p3984_p4 }
  0x9c   :  { %p3987_p7 = pnand %p3986_p6, %p3980_p3 }
  0x9e   :  { %3990 = shalt.err (!%p3987_p7)
}
  0x9f   :  { %279 = dma.hbm_to_vmem [thread:$0]  %s4643_s30, 16, %s277_s16, [#allocation7]  }
  0xa0   :  { %s3991_s28 = scalar_lea.hbm %s4658_s4, 16 }
  0xa1   :  { %p3992_p8 = scmp.ne.s32.totalorder %s4658_s4, %s3991_s28  ;;  %p3995_p9 = scmp.lt.u32.totalorder %s3991_s28, %s4658_s4 }
  0xa3   :  { %p3997_p10 = pnand %p3995_p9, %p3992_p8 }
  0xa5   :  { %4000 = shalt.err (!%p3997_p10)
}
  0xa6   :  { %s4001_s1 = scalar_lea.vmem %s299_s22, 16  ;;  %s4005_s2 = scalar_lea.vmem %s299_s22, 32 }
  0xa7   :  { %p4002_p11 = scmp.ne.s32.totalorder %s299_s22, %s4001_s1  ;;  %p4006_p12 = scmp.lt.s32.totalorder %s299_s22, %s299_s22 }
  0xa8   :  { %p4007_p13 = scmp.lt.s32.totalorder %s4005_s2, %s4001_s1 }
  0xaa   :  { %p4008_p0 = por %p4007_p13, %p4006_p12 }
  0xac   :  { %p4009_p1 = pnand %p4008_p0, %p4002_p11 }
  0xae   :  { %4012 = shalt.err (!%p4009_p1)
}
  0xaf   :  { %301 = dma.hbm_to_vmem [thread:$0]  %s4658_s4, 16, %s299_s22, [#allocation10]  }
  0xb0   :  { %s4355_s7 = smov [#allocation12]   ;;  %s4356_s10 = smov [#allocation2]  }
  0xb1   :  { %s320_s30 = sshll.u32 %s4355_s7, 4  ;;  %s266_s11 = sshll.u32 %s4356_s10, 4  ;;  %s321_s30 = int_to_ptr.vmem [resolvable:$true] %s320_s30  ;;  %s267_s11 = int_to_ptr.vmem [resolvable:$true] %s266_s11 }
  0xb2   :  { %s4013_s15 = scalar_lea.hbm %s4673_s20, 16 }
  0xb3   :  { %p4014_p2 = scmp.ne.s32.totalorder %s4673_s20, %s4013_s15  ;;  %p4017_p3 = scmp.lt.u32.totalorder %s4013_s15, %s4673_s20 }
  0xb5   :  { %p4019_p4 = pnand %p4017_p3, %p4014_p2 }
  0xb7   :  { %4022 = shalt.err (!%p4019_p4)
}
  0xb8   :  { %s4023_s16 = scalar_lea.vmem %s321_s30, 16  ;;  %s4027_s18 = scalar_lea.vmem %s321_s30, 32 }
  0xb9   :  { %p4024_p5 = scmp.ne.s32.totalorder %s321_s30, %s4023_s16  ;;  %p4028_p6 = scmp.lt.s32.totalorder %s321_s30, %s321_s30 }
  0xba   :  { %p4029_p7 = scmp.lt.s32.totalorder %s4027_s18, %s4023_s16 }
  0xbc   :  { %p4030_p8 = por %p4029_p7, %p4028_p6 }
  0xbe   :  { %p4031_p9 = pnand %p4030_p8, %p4024_p5 }
  0xc0   :  { %4034 = shalt.err (!%p4031_p9)
}
  0xc1   :  { %323 = dma.hbm_to_vmem [thread:$0]  %s4673_s20, 16, %s321_s30, [#allocation13]  }
  0xc2   :  { %s4035_s4 = scalar_lea.hbm %s4638_s27, 16 }
  0xc3   :  { %p4036_p10 = scmp.ne.s32.totalorder %s4638_s27, %s4035_s4  ;;  %p4039_p11 = scmp.lt.u32.totalorder %s4035_s4, %s4638_s27 }
  0xc5   :  { %p4041_p12 = pnand %p4039_p11, %p4036_p10 }
  0xc7   :  { %4044 = shalt.err (!%p4041_p12)
}
  0xc8   :  { %s4045_s22 = scalar_lea.vmem %s267_s11, 16  ;;  %s4049_s0 = scalar_lea.vmem %s267_s11, 32 }
  0xc9   :  { %p4046_p13 = scmp.ne.s32.totalorder %s267_s11, %s4045_s22  ;;  %p4050_p0 = scmp.lt.s32.totalorder %s267_s11, %s267_s11 }
  0xca   :  { %p4051_p1 = scmp.lt.s32.totalorder %s4049_s0, %s4045_s22 }
  0xcc   :  { %p4052_p2 = por %p4051_p1, %p4050_p0 }
  0xce   :  { %p4053_p3 = pnand %p4052_p2, %p4046_p13 }
  0xd0   :  { %4056 = shalt.err (!%p4053_p3)
}
  0xd1   :  { %269 = dma.hbm_to_vmem [thread:$0]  %s4638_s27, 16, %s267_s11, [#allocation3]  }
  0xd2   :  { %s4357_s23 = smov [#allocation8]   ;;  %s4358_s26 = smov [#allocation11]  }
  0xd3   :  { %s288_s20 = sshll.u32 %s4357_s23, 4  ;;  %s310_s28 = sshll.u32 %s4358_s26, 4  ;;  %s289_s20 = int_to_ptr.vmem [resolvable:$true] %s288_s20  ;;  %s311_s28 = int_to_ptr.vmem [resolvable:$true] %s310_s28 }
  0xd4   :  { %s4057_s1 = scalar_lea.hbm %s4653_s9, 16 }
  0xd5   :  { %p4058_p4 = scmp.ne.s32.totalorder %s4653_s9, %s4057_s1  ;;  %p4061_p5 = scmp.lt.u32.totalorder %s4057_s1, %s4653_s9 }
  0xd7   :  { %p4063_p6 = pnand %p4061_p5, %p4058_p4 }
  0xd9   :  { %4066 = shalt.err (!%p4063_p6)
}
  0xda   :  { %s4067_s2 = scalar_lea.vmem %s289_s20, 16  ;;  %s4071_s7 = scalar_lea.vmem %s289_s20, 32 }
  0xdb   :  { %p4068_p7 = scmp.ne.s32.totalorder %s289_s20, %s4067_s2  ;;  %p4072_p8 = scmp.lt.s32.totalorder %s289_s20, %s289_s20 }
  0xdc   :  { %p4073_p9 = scmp.lt.s32.totalorder %s4071_s7, %s4067_s2 }
  0xde   :  { %p4074_p10 = por %p4073_p9, %p4072_p8 }
  0xe0   :  { %p4075_p11 = pnand %p4074_p10, %p4068_p7 }
  0xe2   :  { %4078 = shalt.err (!%p4075_p11)
}
  0xe3   :  { %291 = dma.hbm_to_vmem [thread:$0]  %s4653_s9, 16, %s289_s20, [#allocation7]  }
  0xe4   :  { %s4079_s27 = scalar_lea.hbm %s4668_s13, 16 }
  0xe5   :  { %p4080_p12 = scmp.ne.s32.totalorder %s4668_s13, %s4079_s27  ;;  %p4083_p13 = scmp.lt.u32.totalorder %s4079_s27, %s4668_s13 }
  0xe7   :  { %p4085_p0 = pnand %p4083_p13, %p4080_p12 }
  0xe9   :  { %4088 = shalt.err (!%p4085_p0)
}
  0xea   :  { %s4089_s30 = scalar_lea.vmem %s311_s28, 16  ;;  %s4093_s10 = scalar_lea.vmem %s311_s28, 32 }
  0xeb   :  { %p4090_p1 = scmp.ne.s32.totalorder %s311_s28, %s4089_s30  ;;  %p4094_p2 = scmp.lt.s32.totalorder %s311_s28, %s311_s28 }
  0xec   :  { %p4095_p3 = scmp.lt.s32.totalorder %s4093_s10, %s4089_s30 }
  0xee   :  { %p4096_p4 = por %p4095_p3, %p4094_p2 }
  0xf0   :  { %p4097_p5 = pnand %p4096_p4, %p4090_p1 }
  0xf2   :  { %4100 = shalt.err (!%p4097_p5)
}
  0xf3   :  { %313 = dma.hbm_to_vmem [thread:$0]  %s4668_s13, 16, %s311_s28, [#allocation10]  }
  0xf4   :  { %s4359_s11 = smov [#allocation14]   ;;  %s4360_s15 = smov [#allocation15]  }
  0xf5   :  { %s332_s9 = sshll.u32 %s4359_s11, 4  ;;  %s342_s16 = sshll.u32 %s4360_s15, 4  ;;  %s333_s9 = int_to_ptr.vmem [resolvable:$true] %s332_s9  ;;  %s343_s16 = int_to_ptr.vmem [resolvable:$true] %s342_s16 }
  0xf6   :  { %s4101_s18 = scalar_lea.hbm %s4683_s12, 16 }
  0xf7   :  { %p4102_p6 = scmp.ne.s32.totalorder %s4683_s12, %s4101_s18  ;;  %p4105_p7 = scmp.lt.u32.totalorder %s4101_s18, %s4683_s12 }
  0xf9   :  { %p4107_p8 = pnand %p4105_p7, %p4102_p6 }
  0xfb   :  { %4110 = shalt.err (!%p4107_p8)
}
  0xfc   :  { %s4111_s4 = scalar_lea.vmem %s333_s9, 16  ;;  %s4115_s22 = scalar_lea.vmem %s333_s9, 32 }
  0xfd   :  { %p4112_p9 = scmp.ne.s32.totalorder %s333_s9, %s4111_s4  ;;  %p4116_p10 = scmp.lt.s32.totalorder %s333_s9, %s333_s9 }
  0xfe   :  { %p4117_p11 = scmp.lt.s32.totalorder %s4115_s22, %s4111_s4 }
 0x100   :  { %p4118_p12 = por %p4117_p11, %p4116_p10 }
 0x102   :  { %p4119_p13 = pnand %p4118_p12, %p4112_p9 }
 0x104   :  { %4122 = shalt.err (!%p4119_p13)
}
 0x105   :  { %335 = dma.hbm_to_vmem [thread:$0]  %s4683_s12, 16, %s333_s9, [#allocation13]  }
 0x106   :  { %s4123_s13 = scalar_lea.hbm %s4688_s24, 16 }
 0x107   :  { %p4124_p0 = scmp.ne.s32.totalorder %s4688_s24, %s4123_s13  ;;  %p4127_p1 = scmp.lt.u32.totalorder %s4123_s13, %s4688_s24 }
 0x109   :  { %p4129_p2 = pnand %p4127_p1, %p4124_p0 }
 0x10b   :  { %4132 = shalt.err (!%p4129_p2)
}
 0x10c   :  { %s4133_s0 = scalar_lea.vmem %s343_s16, 16  ;;  %s4137_s23 = scalar_lea.vmem %s343_s16, 32 }
 0x10d   :  { %p4134_p3 = scmp.ne.s32.totalorder %s343_s16, %s4133_s0  ;;  %p4138_p4 = scmp.lt.s32.totalorder %s343_s16, %s343_s16 }
 0x10e   :  { %p4139_p5 = scmp.lt.s32.totalorder %s4137_s23, %s4133_s0 }
 0x110   :  { %p4140_p6 = por %p4139_p5, %p4138_p4 }
 0x112   :  { %p4141_p7 = pnand %p4140_p6, %p4134_p3 }
 0x114   :  { %4144 = shalt.err (!%p4141_p7)
}
 0x115   :  { %345 = dma.hbm_to_vmem [thread:$0]  %s4688_s24, 16, %s343_s16, [#allocation16]  }
 0x116   :  { %s4145_s20 = scalar_lea.hbm %s4693_s8, 16 }
 0x117   :  { %p4146_p8 = scmp.ne.s32.totalorder %s4693_s8, %s4145_s20  ;;  %p4149_p9 = scmp.lt.u32.totalorder %s4145_s20, %s4693_s8 }
 0x119   :  { %p4151_p10 = pnand %p4149_p9, %p4146_p8 }
 0x11b   :  { %4154 = shalt.err (!%p4151_p10)
}
 0x11c   :  { %s4361_s12 = smov [#allocation17]  }
 0x11d   :  { %353 = dma.hbm_to_smem %s4693_s8, 16, %s4361_s12, [#allocation5]  }
 0x11e   :  { %4265 = dma.done.wait [#allocation3], 16  }
 0x11f   :  { %4266 = vsyncadd [#allocation3], 4294967280 }
 0x120   :  { %4267 = dma.done.wait [#allocation7], 32  }
 0x121   :  { %4268 = vsyncadd [#allocation7], 4294967264 }
 0x122   :  { %4269 = dma.done.wait [#allocation10], 32  }
 0x123   :  { %4270 = vsyncadd [#allocation10], 4294967264 }
 0x124   :  { %4271 = dma.done.wait [#allocation13], 32  }
 0x125   :  { %4272 = vsyncadd [#allocation13], 4294967264 }
 0x126   :  { %4273 = dma.done.wait [#allocation16], 16  }
 0x127   :  { %4274 = vsyncadd [#allocation16], 4294967280 }
 0x128   :  { %4275 = dma.done.wait [#allocation5], 16  }
 0x129   :  { %4276 = vsyncadd [#allocation5], 4294967280 }
 0x12a   :  { %381 = sfence }
 0x12b   :  { %v385_v0 = vld [vmem:[%s4393_s17] sm:$0xff]  ;;  %v386_v1 = vld [vmem:[%s4393_s17 + $0x8] sm:$0xff]  ;;  %v387_v2 = vld [vmem:[%s4393_s17 + $0x10] sm:$0xff]  ;;  %v4362_v3 = vmov 0.0|0.0   ;;  %vm4363_vm0 = vmmov 0   ;;  %v4364_v6 = vmov 0.0  }
 0x12c   :  { %3769 = vmatprep.subr.bf16.mxu0 %v4362_v3  ;;  %v3770_v4 = vpack.c.bf16 %v386_v1, %v385_v0  ;;  %v388_v5 = vld [vmem:[%s4393_s17 + $0x18] sm:$0xff]  ;;  %3514 = vmatprep.mubr.msk.f32.mxu0 %vm4363_vm0, %v4364_v6  ;;  %v475_v8 = vld [vmem:[%s4403_s25] sm:$0xff]  ;;  %v476_v9 = vld [vmem:[%s4403_s25 + $0x8] sm:$0xff]  ;;  %vm400_vm1 = vcmask 523264   ;;  %vm486_vm2 = vcmask 261120   ;;  %s5163_s8 = sld [smem:[#allocation42_spill]] }
 0x12d   :  { %3781 = vmatprep.subr.bf16.mxu1 %v4362_v3  ;;  %3525 = vmatprep.mubr.msk.f32.mxu1 %vm4363_vm0, %v4364_v6  ;;  %v3773_v7 = vpack.c.bf16 %v388_v5, %v387_v2  ;;  %v389_v10 = vld [vmem:[%s4393_s17 + $0x20] sm:$0xff]  ;;  %v390_v11 = vld [vmem:[%s4393_s17 + $0x28] sm:$0xff]  ;;  %v3782_v12 = vpack.c.bf16 %v476_v9, %v475_v8  ;;  %v391_v14 = vld [vmem:[%s4393_s17 + $0x30] sm:$0xff]  ;;  %vm570_vm3 = vcmask 130048   ;;  %vm644_vm4 = vcmask 64512   ;;  %s5167_s24 = sld [smem:[#allocation44_spill]] }
 0x12e   :  { %3771 = vmatpush3.bf16.msra.mxu0 %v3770_v4  ;;  %v3776_v13 = vpack.c.bf16 %v390_v11, %v389_v10  ;;  %v392_v15 = vld [vmem:[%s4393_s17 + $0x38] sm:$0xff]  ;;  %v382_v17 = vld [vmem:[%s4378_s5] sm:$0xff]  ;;  %v477_v18 = vld [vmem:[%s4403_s25 + $0x10] sm:$0xff]  ;;  %s5161_s17 = sld [smem:[#allocation36_spill]]  ;;  %s5162_s5 = sld [smem:[#allocation38_spill]]  ;;  %vm809_vm5 = vcmask 15360  }
 0x12f   :  { %3772 = vmatprep.subr.bf16.mxu0 %v4362_v3  ;;  %3783 = vmatpush3.bf16.msra.mxu1 %v3782_v12  ;;  %v3779_v16 = vpack.c.bf16 %v392_v15, %v391_v14  ;;  %v478_v19 = vld [vmem:[%s4403_s25 + $0x18] sm:$0xff]  ;;  %v3311_v21 = vld [vmem:[%s4398_s21] ss:$0 sm:$0xff]  ;;  %v562_v27 = vld [vmem:[%s4413_s3 + $0x8] sm:$0xff]  ;;  %s5164_s25 = sld [smem:[#allocation37_spill]]  ;;  %s5165_s21 = sld [smem:[#allocation40_spill]] }
 0x130   :  { %3784 = vmatprep.subr.bf16.mxu1 %v4362_v3  ;;  %v3785_v20 = vpack.c.bf16 %v478_v19, %v477_v18  ;;  %v561_v26 = vld [vmem:[%s4413_s3] sm:$0xff]  ;;  %s5166_s3 = sld [smem:[#allocation39_spill]]  ;;  %s5168_s26 = sld [smem:[#allocation43_spill]] }
 0x131   :  { %v3788_v28 = vpack.c.bf16 %v562_v27, %v561_v26  ;;  %s5169_s28 = sld [smem:[#allocation46_spill]]  ;;  %s5170_s1 = sld [smem:[#allocation41_spill]] }
 0x132   :  { %3774 = vmatpush3.bf16.msra.mxu0 %v3773_v7  ;;  %v811_v35 = vld [vmem:[%s5163_s8] sm:$0xff]  ;;  %v812_v36 = vld [vmem:[%s5163_s8 + $0x8] sm:$0xff]  ;;  %v813_v42 = vld [vmem:[%s5163_s8 + $0x10] sm:$0xff]  ;;  %s5171_s2 = sld [smem:[#allocation85_spill]]  ;;  %s5173_s27 = sld [smem:[#allocation48_spill]] }
 0x133   :  { %3775 = vmatprep.subr.bf16.mxu0 %v4362_v3  ;;  %3786 = vmatpush3.bf16.msra.mxu1 %v3785_v20  ;;  %v3791_v39 = vpack.c.bf16 %v812_v36, %v811_v35  ;;  %v814_v43 = vld [vmem:[%s5163_s8 + $0x18] sm:$0xff]  ;;  %v815_v45 = vld [vmem:[%s5163_s8 + $0x20] sm:$0xff]  ;;  %v816_v46 = vld [vmem:[%s5163_s8 + $0x28] sm:$0xff]  ;;  %s5172_s7 = sld [smem:[#allocation45_spill]]  ;;  %s5174_s30 = sld [smem:[#allocation34_spill]] }
 0x134   :  { %3787 = vmatprep.subr.bf16.mxu1 %v4362_v3  ;;  %v3313_v29 = vld [vmem:[%s5161_s17] ss:$0 sm:$0xff]  ;;  %v3794_v44 = vpack.c.bf16 %v814_v43, %v813_v42  ;;  %v3797_v47 = vpack.c.bf16 %v816_v46, %v815_v45  ;;  %v817_v48 = vld [vmem:[%s5163_s8 + $0x30] sm:$0xff]  ;;  %v818_v49 = vld [vmem:[%s5163_s8 + $0x38] sm:$0xff]  ;;  %s5175_s10 = sld [smem:[#allocation50_spill]]  ;;  %s5176_s11 = sld [smem:[#allocation47_spill]] }
 0x135   :  { %v646_v34 = vld [vmem:[%s5162_s5] sm:$0xff]  ;;  %v3800_v50 = vpack.c.bf16 %v818_v49, %v817_v48  ;;  %v898_v54 = vld [vmem:[%s5167_s24 + $0x8] sm:$0xff]  ;;  %v899_v60 = vld [vmem:[%s5167_s24 + $0x10] sm:$0xff]  ;;  %s5177_s9 = sld [smem:[#allocation49_spill]]  ;;  %s5178_s15 = sld [smem:[#allocation52_spill]] }
 0x136   :  { %3777 = vmatpush3.bf16.msra.mxu0 %v3776_v13  ;;  %v3315_v37 = vld [vmem:[%s5164_s25] ss:$0 sm:$0xff]  ;;  %v900_v61 = vld [vmem:[%s5167_s24 + $0x18] sm:$0xff]  ;;  %s5179_s16 = sld [smem:[#allocation51_spill]]  ;;  %s5180_s18 = sld [smem:[#allocation54_spill]] }
 0x137   :  { %3778 = vmatprep.subr.bf16.mxu0 %v4362_v3  ;;  %v728_v51 = vld [vmem:[%s5165_s21] sm:$0xff]  ;;  %v3806_v62 = vpack.c.bf16 %v900_v61, %v899_v60  ;;  %v983_v7 = vld [vmem:[%s5169_s28 + $0x8] sm:$0xff]  ;;  %s5181_s4 = sld [smem:[#allocation53_spill]]  ;;  %s5182_s22 = sld [smem:[#allocation56_spill]] }
 0x138   :  { %v3317_v52 = vld [vmem:[%s5166_s3] ss:$0 sm:$0xff]  ;;  %v1066_v15 = vld [vmem:[%s5173_s27 + $0x8] sm:$0xff]  ;;  %v1071_v27 = vld [vmem:[%s5173_s27 + $0x30] sm:$0xff]  ;;  %s5183_s13 = sld [smem:[#allocation58_spill]]  ;;  %s5184_s0 = sld [smem:[#allocation55_spill]] }
 0x139   :  { %v897_v53 = vld [vmem:[%s5167_s24] sm:$0xff]  ;;  %s5185_s23 = sld [smem:[#allocation60_spill]]  ;;  %s5186_s20 = sld [smem:[#allocation64_spill]] }
 0x13a   :  { %3780 = vmatpush3.bf16.msra.mxu0 %v3779_v16  ;;  %v3803_v58 = vpack.c.bf16 %v898_v54, %v897_v53  ;;  %v3321_v63 = vld [vmem:[%s5168_s26] ss:$0 sm:$0xff]  ;;  %v1157_v35 = vld [vmem:[%s5175_s10 + $0x18] sm:$0xff]  ;;  %s5187_s12 = sld [smem:[#allocation35_spill]]  ;;  %s5188_s17 = sld [smem:[#allocation57_spill]] }
 0x13b   :  { %3540 = vmatprep.subr.mxu0 %v4364_v6  ;;  %v982_v5 = vld [vmem:[%s5169_s28] sm:$0xff]  ;;  %v1240_v48 = vld [vmem:[%s5178_s15 + $0x8] sm:$0xff]  ;;  %s5189_s5 = sld [smem:[#allocation62_spill]]  ;;  %s5190_s8 = sld [smem:[#allocation61_spill]] }
 0x13c   :  { %v3809_v8 = vpack.c.bf16 %v983_v7, %v982_v5  ;;  %v3319_v9 = vld [vmem:[%s5170_s1] ss:$0 sm:$0xff]  ;;  %s5191_s25 = sld [smem:[#allocation66_spill]]  ;;  %s5192_s21 = sld [smem:[#allocation65_spill]] }
 0x13d   :  { %3515 = vmatmul.mubr.msk.f32.vlgmr.msra.gmra.mrb[0].mxu0 %vm400_vm1, %v382_v17  ;;  %v3323_v13 = vld [vmem:[%s5172_s7] ss:$0 sm:$0xff]  ;;  %v1405_v61 = vld [vmem:[%s5182_s22 + $0x8] sm:$0xff]  ;;  %s5193_s3 = sld [smem:[#allocation68_spill]]  ;;  %s5194_s24 = sld [smem:[#allocation70_spill]] }
 0x13e   :  { %3542 = vmatprep.mubr.msk.f32.mxu0 %vm4363_vm0, %v4364_v6  ;;  %3541 = vmatpush3.msra.mxu0 %v728_v51  ;;  %v1065_v14 = vld [vmem:[%s5173_s27] sm:$0xff]  ;;  %s5195_s26 = sld [smem:[#allocation59_spill]]  ;;  %s5196_s28 = sld [smem:[#allocation63_spill]] }
 0x13f   :  { %3802 = vmatprep.subr.bf16.mxu0 %v4362_v3  ;;  %v3812_v19 = vpack.c.bf16 %v1066_v15, %v1065_v14  ;;  %v3327_v42 = vld [vmem:[%s5177_s9] ss:$0 sm:$0xff]  ;;  %v1813_v14 = vld [vmem:[%s5186_s20 + $0x10] sm:$0xff]  ;;  %v1814_v15 = vld [vmem:[%s5186_s20 + $0x18] sm:$0xff]  ;;  %s5197_s1 = sld [smem:[#allocation67_spill]]  ;;  %s5199_s7 = sld [smem:[#allocation69_spill]] }
 0x140   :  { %v1404_v60 = vld [vmem:[%s5182_s22] sm:$0xff]  ;;  %s2148_s9 = sld [smem:[#allocation17]]  ;;  %s5205_s22 = sld [smem:[#allocation76_spill]] }
 0x210   :  { %v470_v22 = vpop.f32.mrb[0].mxu0 }
 0x211   :  { %v471_v23 = vadd.f32 %v3311_v21, %v470_v22  ;;  %v3516_v24 = vpop.f32.mrb[1].mxu0  ;;  %v1067_v21 = vld [vmem:[%s5173_s27 + $0x10] sm:$0xff]  ;;  %v1068_v22 = vld [vmem:[%s5173_s27 + $0x18] sm:$0xff] }
 0x212   :  { %v1069_v24 = vld [vmem:[%s5173_s27 + $0x20] sm:$0xff] }
 0x213   :  { %v474_v25 = vmax.f32 %v471_v23, 0.0  ;;  %v3815_v23 = vpack.c.bf16 %v1068_v22, %v1067_v21  ;;  %v1818_v21 = vld [vmem:[%s5186_s20 + $0x38] sm:$0xff] }
 0x215   :  { %3526 = vmatmul.mubr.msk.f32.vlgmr.msra.gmra.mrb[0].mxu1 %vm486_vm2, %v474_v25  ;;  %v1070_v25 = vld [vmem:[%s5173_s27 + $0x28] sm:$0xff] }
 0x216   :  { %3532 = vmatprep.mubr.msk.f32.mxu1 %vm4363_vm0, %v4364_v6  ;;  %3789 = vmatpush3.bf16.msra.mxu1 %v3788_v28  ;;  %v3818_v26 = vpack.c.bf16 %v1070_v25, %v1069_v24  ;;  %v1072_v28 = vld [vmem:[%s5173_s27 + $0x38] sm:$0xff]  ;;  %v1489_v24 = vld [vmem:[%s5183_s13 + $0x10] sm:$0xff]  ;;  %s5200_s27 = sld [smem:[#allocation81_spill]] }
 0x217   :  { %3535 = vmatprep.subr.mxu1 %v4364_v6  ;;  %v1490_v25 = vld [vmem:[%s5183_s13 + $0x18] sm:$0xff] }
 0x2e8   :  { %v556_v30 = vpop.f32.mrb[0].mxu1 }
 0x2e9   :  { %v557_v31 = vadd.f32 %v3313_v29, %v556_v30  ;;  %v3527_v32 = vpop.f32.mrb[1].mxu1  ;;  %v3821_v29 = vpack.c.bf16 %v1072_v28, %v1071_v27  ;;  %v383_v30 = vld [vmem:[%s5174_s30] sm:$0xff]  ;;  %s5201_s30 = sld [smem:[#allocation71_spill]] }
 0x2ea   :  { %v1155_v32 = vld [vmem:[%s5175_s10 + $0x8] sm:$0xff]  ;;  %v3335_v27 = vld [vmem:[%s5188_s17] ss:$0 sm:$0xff] }
 0x2eb   :  { %v560_v33 = vmax.f32 %v557_v31, 0.0  ;;  %v1154_v31 = vld [vmem:[%s5175_s10] sm:$0xff] }
 0x2ec   :  { %v1726_v28 = vld [vmem:[%s5189_s5] sm:$0xff] }
 0x2ed   :  { %3533 = vmatmul.mubr.msk.f32.vlgmr.msra.gmra.mrb[2].mxu1 %vm570_vm3, %v560_v33  ;;  %v3824_v33 = vpack.c.bf16 %v1155_v32, %v1154_v31 }
 0x2ee   :  { %3536 = vmatpush3.msra.mxu1 %v646_v34  ;;  %3537 = vmatprep.mubr.msk.f32.mxu1 %vm4363_vm0, %v4364_v6  ;;  %v1156_v34 = vld [vmem:[%s5175_s10 + $0x10] sm:$0xff]  ;;  %s5202_s10 = sld [smem:[#allocation82_spill]] }
 0x2ef   :  { %3790 = vmatprep.subr.bf16.mxu1 %v4362_v3  ;;  %v3827_v36 = vpack.c.bf16 %v1157_v35, %v1156_v34  ;;  %v1728_v35 = vld [vmem:[%s5189_s5 + $0x10] sm:$0xff] }
 0x3c0   :  { %v640_v38 = vpop.f32.mrb[2].mxu1 }
 0x3c1   :  { %v4810_v40 = vadd.f32 %v3315_v37, %v640_v38  ;;  %v3534_v41 = vpop.f32.mrb[3].mxu1  ;;  %v3325_v37 = vld [vmem:[%s5176_s11] ss:$0 sm:$0xff]  ;;  %s5203_s11 = sld [smem:[#allocation83_spill]] }
 0x3c3   :  { %3538 = vmatmul.mubr.msk.f32.vlgmr.msra.gmra.mrb[4].mxu1 %vm644_vm4, %v4810_v40  ;;  %645 = vst.msk [vmem:[#allocation18] sm:$0xff] %vm644_vm4, %v4810_v40 }
 0x3c4   :  { %3792 = vmatpush3.bf16.msra.mxu1 %v3791_v39  ;;  %3561 = vmatprep.mubr.msk.f32.mxu1 %vm4363_vm0, %v4364_v6 }
 0x3c5   :  { %3793 = vmatprep.subr.bf16.mxu1 %v4362_v3 }
 0x3c8   :  { %3795 = vmatpush3.bf16.msra.mxu1 %v3794_v44 }
 0x3c9   :  { %3796 = vmatprep.subr.bf16.mxu1 %v4362_v3 }
 0x3cc   :  { %3798 = vmatpush3.bf16.msra.mxu1 %v3797_v47  ;;  %v1239_v47 = vld [vmem:[%s5178_s15] sm:$0xff]  ;;  %s3356_s15 = sld [smem:[#allocation17 + $0x1]] }
 0x3cd   :  { %3799 = vmatprep.subr.bf16.mxu1 %v4362_v3  ;;  %v3830_v49 = vpack.c.bf16 %v1240_v48, %v1239_v47  ;;  %v1901_v47 = vld [vmem:[%s5191_s25 + $0x8] sm:$0xff] }
 0x3d0   :  { %3801 = vmatpush3.bf16.msra.mxu1 %v3800_v50  ;;  %v3329_v50 = vld [vmem:[%s5179_s16] ss:$0 sm:$0xff]  ;;  %s5204_s16 = sld [smem:[#allocation72_spill]] }
 0x3d1   :  { %3823 = vmatprep.subr.bf16.mxu1 %v4362_v3 }
 0x3d3   :  { %3562 = vmatmul.mubr.msk.f32.vlgmr.msra.gmra.mrb[6].mxu1 %vm400_vm1, %v382_v17 }
 0x3d4   :  { %3609 = vmatprep.mubr.msk.f32.mxu1 %vm4363_vm0, %v4364_v6  ;;  %3825 = vmatpush3.bf16.msra.mxu1 %v3824_v33 }
 0x3d5   :  { %3826 = vmatprep.subr.bf16.mxu1 %v4362_v3 }
 0x3d8   :  { %3828 = vmatpush3.bf16.msra.mxu1 %v3827_v36  ;;  %v1729_v36 = vld [vmem:[%s5189_s5 + $0x18] sm:$0xff] }
 0x3d9   :  { %3829 = vmatprep.subr.bf16.mxu1 %v4362_v3 }
 0x496   :  { %v723_v55 = vpop.f32.mrb[4].mxu1 }
 0x497   :  { %v724_v56 = vadd.f32 %v3317_v52, %v723_v55  ;;  %v3539_v57 = vpop.f32.mrb[5].mxu1  ;;  %v1322_v55 = vld [vmem:[%s5180_s18] sm:$0xff]  ;;  %s3361_s18 = sld [smem:[#allocation17 + $0x2]] }
 0x499   :  { %v727_v59 = vmax.f32 %v724_v56, 0.0  ;;  %v3331_v56 = vld [vmem:[%s5181_s4] ss:$0 sm:$0xff]  ;;  %s3366_s4 = sld [smem:[#allocation17 + $0x3]] }
 0x49b   :  { %3543 = vmatmul.mubr.msk.f32.vlgmr.msra.gmra.mrb[2].mxu0 %vm644_vm4, %v727_v59 }
 0x49c   :  { %3804 = vmatpush3.bf16.msra.mxu0 %v3803_v58  ;;  %3572 = vmatprep.mubr.msk.f32.mxu0 %vm4363_vm0, %v4364_v6 }
 0x49d   :  { %3805 = vmatprep.subr.bf16.mxu0 %v4362_v3 }
 0x4a0   :  { %3807 = vmatpush3.bf16.msra.mxu0 %v3806_v62  ;;  %v3833_v62 = vpack.c.bf16 %v1405_v61, %v1404_v60  ;;  %v1985_v60 = vld [vmem:[%s5193_s3] sm:$0xff]  ;;  %v1986_v61 = vld [vmem:[%s5193_s3 + $0x8] sm:$0xff] }
 0x4a1   :  { %3808 = vmatprep.subr.bf16.mxu0 %v4362_v3 }
 0x4a6   :  { %v892_v0 = vpop.f32.mrb[6].mxu1 }
 0x4a7   :  { %v893_v1 = vadd.f32 %v3321_v63, %v892_v0  ;;  %v3563_v2 = vpop.f32.mrb[7].mxu1  ;;  %v1487_v63 = vld [vmem:[%s5183_s13] sm:$0xff]  ;;  %v1488_v0 = vld [vmem:[%s5183_s13 + $0x8] sm:$0xff]  ;;  %s5206_s13 = sld [smem:[#allocation74_spill]] }
 0x4a8   :  { %v3333_v2 = vld [vmem:[%s5184_s0] ss:$0 sm:$0xff]  ;;  %s5207_s0 = sld [smem:[#allocation73_spill]] }
 0x4a9   :  { %v896_v4 = vmax.f32 %v893_v1, 0.0  ;;  %v3836_v1 = vpack.c.bf16 %v1488_v0, %v1487_v63  ;;  %v2067_v63 = vld [vmem:[%s5194_s24] sm:$0xff] }
 0x4aa   :  { %v3337_v0 = vld [vmem:[%s5195_s26] ss:$0 sm:$0xff] }
 0x4ab   :  { %3573 = vmatmul.mubr.msk.f32.vlgmr.msra.gmra.mrb[4].mxu0 %vm486_vm2, %v896_v4 }
 0x4ac   :  { %3579 = vmatprep.mubr.msk.f32.mxu0 %vm4363_vm0, %v4364_v6  ;;  %3810 = vmatpush3.bf16.msra.mxu0 %v3809_v8 }
 0x4ad   :  { %3811 = vmatprep.subr.bf16.mxu0 %v4362_v3 }
 0x56e   :  { %v805_v10 = vpop.f32.mrb[2].mxu0 }
 0x56f   :  { %v806_v11 = vadd.f32 %v3319_v9, %v805_v10  ;;  %v3544_v12 = vpop.f32.mrb[3].mxu0  ;;  %v1573_v9 = vld [vmem:[%s5185_s23 + $0x8] sm:$0xff]  ;;  %v1572_v10 = vld [vmem:[%s5185_s23] sm:$0xff]  ;;  %s5208_s23 = sld [smem:[#allocation78_spill]] }
 0x570   :  { %v1812_v12 = vld [vmem:[%s5186_s20 + $0x8] sm:$0xff] }
 0x571   :  { %810 = vst.msk [vmem:[%s5171_s2] sm:$0xff] %vm809_vm5, %v806_v11  ;;  %v1811_v11 = vld [vmem:[%s5186_s20] sm:$0xff]  ;;  %s5198_s2 = sld [smem:[#allocation80_spill]] }
 0x57e   :  { %v977_v16 = vpop.f32.mrb[4].mxu0 }
 0x57f   :  { %v978_v17 = vadd.f32 %v3323_v13, %v977_v16  ;;  %v3574_v18 = vpop.f32.mrb[5].mxu0  ;;  %v3848_v13 = vpack.c.bf16 %v1812_v12, %v1811_v11  ;;  %v3851_v16 = vpack.c.bf16 %v1814_v15, %v1813_v14  ;;  %v2150_v15 = vld [vmem:[%s5198_s2 + $0x8] sm:$0xff] }
 0x580   :  { %v1816_v18 = vld [vmem:[%s5186_s20 + $0x28] sm:$0xff] }
 0x581   :  { %v981_v20 = vmax.f32 %v978_v17, 0.0  ;;  %v1815_v17 = vld [vmem:[%s5186_s20 + $0x20] sm:$0xff] }
 0x583   :  { %3580 = vmatmul.mubr.msk.f32.vlgmr.msra.gmra.mrb[6].mxu0 %vm570_vm3, %v981_v20  ;;  %v1817_v20 = vld [vmem:[%s5186_s20 + $0x30] sm:$0xff]  ;;  %s5209_s20 = sld [smem:[#allocation77_spill]] }
 0x584   :  { %3813 = vmatpush3.bf16.msra.mxu0 %v3812_v19  ;;  %3598 = vmatprep.mubr.msk.f32.mxu0 %vm4363_vm0, %v4364_v6  ;;  %v3854_v19 = vpack.c.bf16 %v1816_v18, %v1815_v17  ;;  %v3857_v22 = vpack.c.bf16 %v1818_v21, %v1817_v20  ;;  %v2149_v20 = vld [vmem:[%s5198_s2] sm:$0xff] }
 0x585   :  { %3814 = vmatprep.subr.bf16.mxu0 %v4362_v3  ;;  %v2319_v21 = vld [vmem:[%s5200_s27] sm:$0xff] }
 0x588   :  { %3816 = vmatpush3.bf16.msra.mxu0 %v3815_v23  ;;  %v384_v23 = vld [vmem:[%s5187_s12] sm:$0xff]  ;;  %s4365_s12 = smov [#allocation19]  }
 0x589   :  { %3817 = vmatprep.subr.bf16.mxu0 %v4362_v3  ;;  %s3177_s17 = sshll.u32 %s4365_s12, 4  ;;  %s3178_s17 = int_to_ptr.vmem [resolvable:$true] %s3177_s17 }
 0x58a   :  { %p4160_p12 = scmp.lt.s32.totalorder %s3178_s17, %s3178_s17 }
 0x58c   :  { %3819 = vmatpush3.bf16.msra.mxu0 %v3818_v26  ;;  %v3839_v26 = vpack.c.bf16 %v1490_v25, %v1489_v24 }
 0x58d   :  { %3820 = vmatprep.subr.bf16.mxu0 %v4362_v3 }
 0x590   :  { %3822 = vmatpush3.bf16.msra.mxu0 %v3821_v29  ;;  %v1727_v29 = vld [vmem:[%s5189_s5 + $0x8] sm:$0xff]  ;;  %s4366_s5 = smov [#allocation22]  }
 0x591   :  { %3832 = vmatprep.subr.bf16.mxu0 %v4362_v3  ;;  %v3842_v33 = vpack.c.bf16 %v1727_v29, %v1726_v28  ;;  %v2490_v29 = vld [vmem:[%s5202_s10 + $0x8] sm:$0xff] }
 0x593   :  { %3599 = vmatmul.mubr.msk.f32.vlgmr.msra.gmra.mrb[8].mxu0 %vm400_vm1, %v383_v30 }
 0x594   :  { %3628 = vmatprep.mubr.msk.f32.mxu0 %vm4363_vm0, %v4364_v6  ;;  %3834 = vmatpush3.bf16.msra.mxu0 %v3833_v62  ;;  %v3866_v62 = vpack.c.bf16 %v1986_v61, %v1985_v60 }
 0x595   :  { %3642 = vmatprep.subr.mxu0 %v4364_v6 }
 0x656   :  { %v1060_v38 = vpop.f32.mrb[6].mxu0 }
 0x657   :  { %v4879_v39 = vadd.f32 %v3325_v37, %v1060_v38  ;;  %v3581_v41 = vpop.f32.mrb[7].mxu0 }
 0x658   :  { %v3845_v41 = vpack.c.bf16 %v1729_v36, %v1728_v35 }
 0x659   :  { %1064 = vst.msk [vmem:[#allocation19] sm:$0xff] %vm644_vm4, %v4879_v39 }
 0x666   :  { %v1149_v43 = vpop.f32.mrb[8].mxu0 }
 0x667   :  { %v1150_v44 = vadd.f32 %v3327_v42, %v1149_v43  ;;  %v3600_v45 = vpop.f32.mrb[9].mxu0  ;;  %v3341_v43 = vld [vmem:[%s5190_s8] ss:$0 sm:$0xff]  ;;  %s3197_s8 = sshll.u32 %s4366_s5, 4  ;;  %s3198_s8 = int_to_ptr.vmem [resolvable:$true] %s3197_s8 }
 0x669   :  { %v1153_v46 = vmax.f32 %v1150_v44, 0.0 }
 0x66b   :  { %3610 = vmatmul.mubr.msk.f32.vlgmr.msra.gmra.mrb[8].mxu1 %vm486_vm2, %v1153_v46  ;;  %v1900_v46 = vld [vmem:[%s5191_s25] sm:$0xff] }
 0x66c   :  { %3616 = vmatprep.mubr.msk.f32.mxu1 %vm4363_vm0, %v4364_v6  ;;  %3831 = vmatpush3.bf16.msra.mxu1 %v3830_v49  ;;  %v3860_v49 = vpack.c.bf16 %v1901_v47, %v1900_v46 }
 0x66d   :  { %3619 = vmatprep.subr.mxu1 %v4364_v6 }
 0x73e   :  { %v1234_v51 = vpop.f32.mrb[8].mxu1 }
 0x73f   :  { %v1235_v52 = vadd.f32 %v3329_v50, %v1234_v51  ;;  %v3611_v53 = vpop.f32.mrb[9].mxu1  ;;  %v1902_v51 = vld [vmem:[%s5191_s25 + $0x10] sm:$0xff] }
 0x741   :  { %v1238_v54 = vmax.f32 %v1235_v52, 0.0  ;;  %v1903_v52 = vld [vmem:[%s5191_s25 + $0x18] sm:$0xff]  ;;  %s4155_s25 = scalar_lea.vmem %s3178_s17, 128 }
 0x742   :  { %v3863_v53 = vpack.c.bf16 %v1903_v52, %v1902_v51  ;;  %p4156_p11 = scmp.ne.s32.totalorder %s3178_s17, %s4155_s25  ;;  %p4161_p13 = scmp.lt.s32.totalorder %s4155_s25, %s4155_s25 }
 0x743   :  { %3617 = vmatmul.mubr.msk.f32.vlgmr.msra.gmra.mrb[10].mxu1 %vm570_vm3, %v1238_v54  ;;  %v3344_v54 = vld [vmem:[%s5192_s21] ss:$0 sm:$0xff] }
 0x744   :  { %3620 = vmatpush3.msra.mxu1 %v1322_v55  ;;  %3621 = vmatprep.mubr.msk.f32.mxu1 %vm4363_vm0, %v4364_v6  ;;  %p4162_p0 = por %p4161_p13, %p4160_p12 }
 0x745   :  { %3835 = vmatprep.subr.bf16.mxu1 %v4362_v3 }
 0x746   :  { %p4163_p1 = pnand %p4162_p0, %p4156_p11 }
 0x816   :  { %v1317_v57 = vpop.f32.mrb[10].mxu1 }
 0x817   :  { %v4897_v58 = vadd.f32 %v3331_v56, %v1317_v57  ;;  %v3618_v59 = vpop.f32.mrb[11].mxu1 }
 0x819   :  { %1321 = vst.msk [vmem:[#allocation21] sm:$0xff] %vm644_vm4, %v4897_v58  ;;  %3622 = vmatmul.mubr.msk.f32.vlgmr.msra.gmra.mrb[12].mxu1 %vm644_vm4, %v4897_v58 }
 0x81a   :  { %3639 = vmatprep.mubr.msk.f32.mxu1 %vm4363_vm0, %v4364_v6  ;;  %3837 = vmatpush3.bf16.msra.mxu1 %v3836_v1 }
 0x81b   :  { %3838 = vmatprep.subr.bf16.mxu1 %v4362_v3 }
 0x81e   :  { %3840 = vmatpush3.bf16.msra.mxu1 %v3839_v26  ;;  %v2320_v26 = vld [vmem:[%s5200_s27 + $0x8] sm:$0xff] }
 0x81f   :  { %3841 = vmatprep.subr.bf16.mxu1 %v4362_v3 }
 0x8ec   :  { %v1399_v4 = vpop.f32.mrb[12].mxu1 }
 0x8ed   :  { %v1400_v5 = vadd.f32 %v3333_v2, %v1399_v4  ;;  %v3623_v7 = vpop.f32.mrb[13].mxu1 }
 0x8ef   :  { %v1403_v8 = vmax.f32 %v1400_v5, 0.0  ;;  %v3342_v5 = vld [vmem:[%s5196_s28] ss:$0 sm:$0xff] }
 0x8f1   :  { %3629 = vmatmul.mubr.msk.f32.vlgmr.msra.gmra.mrb[10].mxu0 %vm570_vm3, %v1403_v8 }
 0x8f2   :  { %3643 = vmatpush3.msra.mxu0 %v1573_v9  ;;  %3644 = vmatprep.mubr.msk.f32.mxu0 %vm4363_vm0, %v4364_v6 }
 0x8f3   :  { %3647 = vmatprep.subr.mxu0 %v4364_v6 }
 0x8f5   :  { %3645 = vmatmul.mubr.msk.f32.vlgmr.msra.gmra.mrb[12].mxu0 %vm644_vm4, %v4810_v40 }
 0x8f6   :  { %3648 = vmatpush3.msra.mxu0 %v1572_v10  ;;  %3649 = vmatprep.mubr.msk.f32.mxu0 %vm4363_vm0, %v4364_v6  ;;  %v3346_v10 = vld [vmem:[%s5197_s1] ss:$0 sm:$0xff] }
 0x8f7   :  { %3847 = vmatprep.subr.bf16.mxu0 %v4362_v3 }
 0x8f9   :  { %3650 = vmatmul.mubr.msk.f32.vlgmr.msra.gmra.mrb[14].mxu0 %vm644_vm4, %v4879_v39 }
 0x8fa   :  { %3849 = vmatpush3.bf16.msra.mxu0 %v3848_v13  ;;  %3679 = vmatprep.mubr.msk.f32.mxu0 %vm4363_vm0, %v4364_v6 }
 0x8fb   :  { %3850 = vmatprep.subr.bf16.mxu0 %v4362_v3 }
 0x8fe   :  { %3852 = vmatpush3.bf16.msra.mxu0 %v3851_v16  ;;  %v3348_v16 = vld [vmem:[%s5199_s7] ss:$0 sm:$0xff] }
 0x8ff   :  { %3853 = vmatprep.subr.bf16.mxu0 %v4362_v3 }
 0x902   :  { %3855 = vmatpush3.bf16.msra.mxu0 %v3854_v19 }
 0x903   :  { %3856 = vmatprep.subr.bf16.mxu0 %v4362_v3 }
 0x906   :  { %3858 = vmatpush3.bf16.msra.mxu0 %v3857_v22  ;;  %v3350_v22 = vld [vmem:[%s5201_s30] ss:$0 sm:$0xff] }
 0x907   :  { %3700 = vmatprep.subr.mxu0 %v4364_v6 }
 0x909   :  { %3680 = vmatmul.mubr.msk.f32.vlgmr.msra.gmra.mrb[16].mxu0 %vm400_vm1, %v384_v23 }
 0x90a   :  { %3702 = vmatprep.mubr.msk.f32.mxu0 %vm4363_vm0, %v4364_v6  ;;  %3701 = vmatpush3.msra.mxu0 %v2067_v63 }
 0x90b   :  { %3710 = vmatprep.subr.mxu0 %v4364_v6 }
 0x9c4   :  { %v1482_v30 = vpop.f32.mrb[10].mxu0 }
 0x9c5   :  { %v1483_v31 = vadd.f32 %v3335_v27, %v1482_v30  ;;  %v3630_v32 = vpop.f32.mrb[11].mxu0 }
 0x9c6   :  { %v2660_v32 = vld [vmem:[%s5203_s11 + $0x8] sm:$0xff] }
 0x9c7   :  { %v1486_v34 = vmax.f32 %v1483_v31, 0.0 }
 0x9c8   :  { %v1640_v37 = vpop.f32.mrb[12].mxu0 }
 0x9c9   :  { %3640 = vmatmul.mubr.msk.f32.vlgmr.msra.gmra.mrb[14].mxu1 %vm486_vm2, %v1486_v34  ;;  %v3646_v38 = vpop.f32.mrb[13].mxu0  ;;  %v3354_v34 = vld [vmem:[#allocation2] ss:$0 sm:$0xff] }
 0x9ca   :  { %3843 = vmatpush3.bf16.msra.mxu1 %v3842_v33  ;;  %3660 = vmatprep.mubr.msk.f32.mxu1 %vm4363_vm0, %v4364_v6 }
 0x9cb   :  { %3844 = vmatprep.subr.bf16.mxu1 %v4362_v3 }
 0x9cc   :  { %v1713_v42 = vpop.f32.mrb[14].mxu0 }
 0x9cd   :  { %v1714_v44 = vadd.f32 %v1713_v42, %v1640_v37  ;;  %v3651_v45 = vpop.f32.mrb[15].mxu0  ;;  %v3355_v42 = vld [vmem:[#allocation6] ss:$0 sm:$0xff] }
 0x9ce   :  { %3846 = vmatpush3.bf16.msra.mxu1 %v3845_v41  ;;  %v3359_v41 = vld [vmem:[#allocation8] ss:$0 sm:$0xff] }
 0x9cf   :  { %v1724_v48 = vadd.f32 %v3341_v43, %v1714_v44  ;;  %3859 = vmatprep.subr.bf16.mxu1 %v4362_v3 }
 0x9d1   :  { %v1725_v50 = vmax.f32 %v1724_v48, 0.0 }
 0x9d3   :  { %3661 = vmatmul.mubr.msk.f32.vlgmr.msra.gmra.mrb[16].mxu1 %vm486_vm2, %v1725_v50 }
 0x9d4   :  { %3861 = vmatpush3.bf16.msra.mxu1 %v3860_v49  ;;  %3690 = vmatprep.mubr.msk.f32.mxu1 %vm4363_vm0, %v4364_v6  ;;  %v3360_v49 = vld [vmem:[#allocation9] ss:$0 sm:$0xff] }
 0x9d5   :  { %3862 = vmatprep.subr.bf16.mxu1 %v4362_v3 }
 0x9d8   :  { %3864 = vmatpush3.bf16.msra.mxu1 %v3863_v53 }
 0x9d9   :  { %3865 = vmatprep.subr.bf16.mxu1 %v4362_v3 }
 0x9dc   :  { %v1895_v55 = vpop.f32.mrb[16].mxu0 }
 0x9dd   :  { %v1896_v56 = vadd.f32 %v3344_v54, %v1895_v55  ;;  %v3681_v57 = vpop.f32.mrb[17].mxu0 }
 0x9de   :  { %v2489_v57 = vld [vmem:[%s5202_s10] sm:$0xff] }
 0x9df   :  { %v1899_v59 = vmax.f32 %v1896_v56, 0.0 }
 0x9e1   :  { %3691 = vmatmul.mubr.msk.f32.vlgmr.msra.gmra.mrb[18].mxu1 %vm486_vm2, %v1899_v59  ;;  %v2314_v59 = vstv %s2148_s9 }
 0x9e2   :  { %3697 = vmatprep.mubr.msk.f32.mxu1 %vm4363_vm0, %v4364_v6  ;;  %3867 = vmatpush3.bf16.msra.mxu1 %v3866_v62  ;;  %v2481_v62 = vstv %s3356_s15 }
 0x9e3   :  { %3705 = vmatprep.subr.mxu1 %v4364_v6 }
 0xa9c   :  { %v1567_v1 = vpop.f32.mrb[14].mxu1 }
 0xa9d   :  { %v1568_v2 = vadd.f32 %v3337_v0, %v1567_v1  ;;  %v3641_v4 = vpop.f32.mrb[15].mxu1 }
 0xa9f   :  { %1571 = vst.msk [vmem:[#allocation22] sm:$0xff] %vm400_vm1, %v1568_v2 }
 0xaa6   :  { %v1806_v7 = vpop.f32.mrb[16].mxu1 }
 0xaa7   :  { %v1807_v8 = vadd.f32 %v3342_v5, %v1806_v7  ;;  %v3662_v9 = vpop.f32.mrb[17].mxu1 }
 0xaa9   :  { %1810 = vst.msk [vmem:[#allocation24] sm:$0xff] %vm400_vm1, %v1807_v8 }
 0xab4   :  { %v1980_v11 = vpop.f32.mrb[18].mxu1 }
 0xab5   :  { %v1981_v12 = vadd.f32 %v3346_v10, %v1980_v11  ;;  %v3692_v13 = vpop.f32.mrb[19].mxu1  ;;  %v2659_v10 = vld [vmem:[%s5203_s11] sm:$0xff] }
 0xab7   :  { %v1984_v14 = vmax.f32 %v1981_v12, 0.0  ;;  %v3364_v12 = vld [vmem:[#allocation11] ss:$0 sm:$0xff] }
 0xab9   :  { %3698 = vmatmul.mubr.msk.f32.vlgmr.msra.gmra.mrb[20].mxu1 %vm570_vm3, %v1984_v14 }
 0xaba   :  { %3707 = vmatprep.mubr.msk.f32.mxu1 %vm4363_vm0, %v4364_v6  ;;  %3706 = vmatpush3.msra.mxu1 %v2150_v15 }
 0xabb   :  { %3715 = vmatprep.subr.mxu1 %v4364_v6 }
 0xb8c   :  { %v2063_v17 = vpop.f32.mrb[20].mxu1 }
 0xb8d   :  { %v2064_v18 = vadd.f32 %v3348_v16, %v2063_v17  ;;  %v3699_v19 = vpop.f32.mrb[21].mxu1  ;;  %v3369_v16 = vld [vmem:[#allocation14] ss:$0 sm:$0xff]  ;;  %v3365_v17 = vld [vmem:[#allocation12] ss:$0 sm:$0xff] }
 0xb8f   :  { %3703 = vmatmul.mubr.msk.f32.vlgmr.msra.gmra.mrb[18].mxu0 %vm644_vm4, %v2064_v18 }
 0xb90   :  { %3711 = vmatpush3.msra.mxu0 %v2149_v20  ;;  %3712 = vmatprep.mubr.msk.f32.mxu0 %vm4363_vm0, %v4364_v6 }
 0xb91   :  { %3720 = vmatprep.subr.mxu0 %v4364_v6 }
 0xb93   :  { %3713 = vmatmul.mubr.msk.f32.vlgmr.msra.gmra.mrb[20].mxu0 %vm644_vm4, %v4879_v39 }
 0xb94   :  { %3721 = vmatpush3.msra.mxu0 %v2319_v21  ;;  %3722 = vmatprep.mubr.msk.f32.mxu0 %vm4363_vm0, %v4364_v6 }
 0xb95   :  { %3730 = vmatprep.subr.mxu0 %v4364_v6 }
 0xb97   :  { %3723 = vmatmul.mubr.msk.f32.vlgmr.msra.gmra.mrb[22].mxu0 %vm644_vm4, %v4879_v39 }
 0xb98   :  { %3732 = vmatprep.mubr.msk.f32.mxu0 %vm4363_vm0, %v4364_v6  ;;  %3731 = vmatpush3.msra.mxu0 %v2489_v57 }
 0xb99   :  { %3740 = vmatprep.subr.mxu0 %v4364_v6 }
 0xc62   :  { %v2144_v23 = vpop.f32.mrb[18].mxu0 }
 0xc63   :  { %v5002_v24 = vadd.f32 %v3350_v22, %v2144_v23  ;;  %v3704_v25 = vpop.f32.mrb[19].mxu0  ;;  %v3370_v23 = vld [vmem:[#allocation15] ss:$0 sm:$0xff] }
 0xc65   :  { %3708 = vmatmul.mubr.msk.f32.vlgmr.msra.gmra.mrb[22].mxu1 %vm644_vm4, %v5002_v24 }
 0xc66   :  { %3716 = vmatpush3.msra.mxu1 %v2320_v26  ;;  %v2290_v27 = vpop.f32.mrb[20].mxu0  ;;  %3717 = vmatprep.mubr.msk.f32.mxu1 %vm4363_vm0, %v4364_v6 }
 0xc67   :  { %v3714_v28 = vpop.f32.mrb[21].mxu0  ;;  %3725 = vmatprep.subr.mxu1 %v4364_v6 }
 0xc68   :  { %v2828_v28 = vld [vmem:[%s5204_s16] sm:$0xff] }
 0xc69   :  { %3718 = vmatmul.mubr.msk.f32.vlgmr.msra.gmra.mrb[24].mxu1 %vm644_vm4, %v5002_v24 }
 0xc6a   :  { %v2457_v30 = vpop.f32.mrb[22].mxu0  ;;  %3726 = vmatpush3.msra.mxu1 %v2490_v29  ;;  %3727 = vmatprep.mubr.msk.f32.mxu1 %vm4363_vm0, %v4364_v6  ;;  %v2654_v29 = vstv %s3361_s18 }
 0xc6b   :  { %v3724_v31 = vpop.f32.mrb[23].mxu0  ;;  %3735 = vmatprep.subr.mxu1 %v4364_v6 }
 0xc6d   :  { %3728 = vmatmul.mubr.msk.f32.vlgmr.msra.gmra.mrb[26].mxu1 %vm644_vm4, %v4810_v40 }
 0xc6e   :  { %3736 = vmatpush3.msra.mxu1 %v2660_v32  ;;  %3737 = vmatprep.mubr.msk.f32.mxu1 %vm4363_vm0, %v4364_v6  ;;  %v2821_v32 = vstv %s3366_s4 }
 0xc6f   :  { %3745 = vmatprep.subr.mxu1 %v4364_v6 }
 0xc71   :  { %3738 = vmatmul.mubr.msk.f32.vlgmr.msra.gmra.mrb[28].mxu1 %vm644_vm4, %v4810_v40 }
 0xc72   :  { %3747 = vmatprep.mubr.msk.f32.mxu1 %vm4363_vm0, %v4364_v6  ;;  %3746 = vmatpush3.msra.mxu1 %v2828_v28 }
 0xc73   :  { %3757 = vmatprep.subr.mxu1 %v4364_v6 }
 0xd38   :  { %v2220_v33 = vpop.f32.mrb[22].mxu1 }
 0xd39   :  { %v2291_v35 = vadd.f32 %v2290_v27, %v2220_v33  ;;  %v3709_v36 = vpop.f32.mrb[23].mxu1 }
 0xd3b   :  { %v2301_v37 = vadd.f32 %v3354_v34, %v2291_v35 }
 0xd3c   :  { %v2387_v38 = vpop.f32.mrb[24].mxu1 }
 0xd3d   :  { %v2302_v43 = vmax.f32 %v2301_v37, 0.0  ;;  %v2458_v44 = vadd.f32 %v2457_v30, %v2387_v38  ;;  %v3719_v45 = vpop.f32.mrb[25].mxu1 }
 0xd3e   :  { %v2910_v45 = vld [vmem:[%s5206_s13] sm:$0xff] }
 0xd3f   :  { %v2468_v46 = vadd.f32 %v3359_v41, %v2458_v44  ;;  %v2310_v47 = vmul.f32 %v3355_v42, %v2302_v43  ;;  %v2992_v44 = vld [vmem:[%s5205_s22] sm:$0xff] }
 0xd40   :  { %v2557_v48 = vpop.f32.mrb[26].mxu1 }
 0xd41   :  { %v2469_v50 = vmax.f32 %v2468_v46, 0.0  ;;  %v3729_v51 = vpop.f32.mrb[27].mxu1  ;;  %v2311_v52 = vsel %vm644_vm4, %v2310_v47, 0.0  ;;  %v2911_v46 = vld [vmem:[%s5206_s13 + $0x8] sm:$0xff] }
 0xd42   :  { %2312 = vadd.xlane.f32.xlu0 %v2311_v52  ;;  %v3869_v47 = vpack.c.bf16 %v2911_v46, %v2910_v45 }
 0xd43   :  { %v2477_v53 = vmul.f32 %v3360_v49, %v2469_v50  ;;  %v3072_v49 = vld [vmem:[%s5208_s23 + $0x8] sm:$0xff] }
 0xd44   :  { %v2727_v54 = vpop.f32.mrb[28].mxu1 }
 0xd45   :  { %v3739_v55 = vpop.f32.mrb[29].mxu1  ;;  %v2478_v56 = vsel %vm644_vm4, %v2477_v53, 0.0  ;;  %v3375_v53 = vld [vmem:[%s5209_s20] ss:$0 sm:$0xff] }
 0xd46   :  { %2479 = vadd.xlane.f32.xlu0 %v2478_v56 }
 0xdcf   :  { %v2313_v60 = vpop.xlane.xlu0 %2312 }
 0xdd0   :  { %v2315_v61 = vadd.f32 %v2314_v59, %v2313_v60 }
 0xdd2   :  { %v2316_v63 = vmul.f32 1.442695, %v2315_v61 }
 0xdd3   :  { %v2480_v0 = vpop.xlane.xlu0 %2479 }
 0xdd4   :  { %v2482_v1 = vadd.f32 %v2481_v62, %v2480_v0  ;;  %3961 = vpow2.f32 %v2316_v63 }
 0xdd6   :  { %v2483_v2 = vmul.f32 1.442695, %v2482_v1 }
 0xdd8   :  { %3963 = vpow2.f32 %v2483_v2 }
 0xdde   :  { %v3962_v4 = vpop.eup %3961 }
 0xddf   :  { %v2485_v7 = vmul.f32 %v3962_v4, %v4879_v39 }
 0xde2   :  { %v3964_v5 = vpop.eup %3963 }
 0xde3   :  { %v2486_v8 = vmul.f32 %v3964_v5, %v5002_v24 }
 0xde5   :  { %v2487_v9 = vadd.f32 %v2486_v8, %v2485_v7 }
 0xde7   :  { %3733 = vmatmul.mubr.msk.f32.vlgmr.msra.gmra.mrb[24].mxu0 %vm644_vm4, %v2487_v9 }
 0xde8   :  { %3741 = vmatpush3.msra.mxu0 %v2659_v10  ;;  %3742 = vmatprep.mubr.msk.f32.mxu0 %vm4363_vm0, %v4364_v6 }
 0xde9   :  { %3868 = vmatprep.subr.bf16.mxu0 %v4362_v3 }
 0xdeb   :  { %3743 = vmatmul.mubr.msk.f32.vlgmr.msra.gmra.mrb[26].mxu0 %vm644_vm4, %v2487_v9 }
 0xdec   :  { %3754 = vmatprep.mubr.msk.f32.mxu0 %vm4363_vm0, %v4364_v6  ;;  %3870 = vmatpush3.bf16.msra.mxu0 %v3869_v47 }
 0xded   :  { %3871 = vmatprep.subr.bf16.mxu0 %v4362_v3 }
 0xeba   :  { %v2630_v11 = vpop.f32.mrb[24].mxu0 }
 0xebb   :  { %v2631_v39 = vadd.f32 %v2630_v11, %v2557_v48  ;;  %v3734_v13 = vpop.f32.mrb[25].mxu0  ;;  %v3371_v48 = vld [vmem:[%s5207_s0] ss:$0 sm:$0xff] }
 0xebd   :  { %v2641_v14 = vadd.f32 %v3364_v12, %v2631_v39 }
 0xebe   :  { %v2797_v15 = vpop.f32.mrb[26].mxu0 }
 0xebf   :  { %v2642_v18 = vmax.f32 %v2641_v14, 0.0  ;;  %v2798_v19 = vadd.f32 %v2797_v15, %v2727_v54  ;;  %v3744_v20 = vpop.f32.mrb[27].mxu0 }
 0xec1   :  { %v2808_v21 = vadd.f32 %v3369_v16, %v2798_v19  ;;  %v2650_v22 = vmul.f32 %v3365_v17, %v2642_v18 }
 0xec3   :  { %v2809_v24 = vmax.f32 %v2808_v21, 0.0  ;;  %v2651_v25 = vsel %vm644_vm4, %v2650_v22, 0.0 }
 0xec4   :  { %2652 = vadd.xlane.f32.xlu1 %v2651_v25 }
 0xec5   :  { %v2817_v26 = vmul.f32 %v3370_v23, %v2809_v24 }
 0xec7   :  { %v2818_v27 = vsel %vm644_vm4, %v2817_v26, 0.0 }
 0xec8   :  { %2819 = vadd.xlane.f32.xlu1 %v2818_v27 }
 0xf51   :  { %v2653_v30 = vpop.xlane.xlu1 %2652 }
 0xf52   :  { %v2655_v31 = vadd.f32 %v2654_v29, %v2653_v30 }
 0xf54   :  { %v2656_v33 = vmul.f32 1.442695, %v2655_v31 }
 0xf55   :  { %v2820_v34 = vpop.xlane.xlu1 %2819 }
 0xf56   :  { %v2822_v35 = vadd.f32 %v2821_v32, %v2820_v34  ;;  %3965 = vpow2.f32 %v2656_v33 }
 0xf58   :  { %v2823_v36 = vmul.f32 1.442695, %v2822_v35 }
 0xf5a   :  { %3967 = vpow2.f32 %v2823_v36 }
 0xf60   :  { %v3966_v37 = vpop.eup %3965 }
 0xf61   :  { %v2825_v41 = vmul.f32 %v3966_v37, %v2487_v9 }
 0xf64   :  { %v3968_v38 = vpop.eup %3967 }
 0xf65   :  { %v2826_v42 = vmul.f32 %v3968_v38, %v4810_v40  ;;  %v3071_v40 = vld [vmem:[%s5208_s23] sm:$0xff] }
 0xf66   :  { %v3872_v54 = vpack.c.bf16 %v3072_v49, %v3071_v40 }
 0xf67   :  { %v2827_v43 = vadd.f32 %v2826_v42, %v2825_v41 }
 0xf69   :  { %3748 = vmatmul.mubr.msk.f32.vlgmr.msra.gmra.mrb[30].mxu1 %vm644_vm4, %v2827_v43 }
 0xf6a   :  { %3758 = vmatpush3.msra.mxu1 %v2992_v44  ;;  %3759 = vmatprep.mubr.msk.f32.mxu1 %vm4363_vm0, %v4364_v6 }
 0xf6d   :  { %3760 = vmatmul.mubr.msk.f32.vlgmr.msra.gmra.mrb[32].mxu1 %vm644_vm4, %v4897_v58 }
0x103c   :  { %v2905_v50 = vpop.f32.mrb[30].mxu1 }
0x103d   :  { %v2906_v51 = vadd.f32 %v3371_v48, %v2905_v50  ;;  %v3749_v52 = vpop.f32.mrb[31].mxu1 }
0x103f   :  { %v2909_v55 = vmax.f32 %v2906_v51, 0.0 }
0x1040   :  { %v3066_v56 = vpop.f32.mrb[32].mxu1 }
0x1041   :  { %v3067_v57 = vadd.f32 %v3375_v53, %v3066_v56  ;;  %3755 = vmatmul.mubr.msk.f32.vlgmr.msra.gmra.mrb[28].mxu0 %vm570_vm3, %v2909_v55  ;;  %v3761_v58 = vpop.f32.mrb[33].mxu1 }
0x1042   :  { %3873 = vmatpush3.bf16.msra.mxu0 %v3872_v54  ;;  %3766 = vmatprep.mubr.msk.f32.mxu0 %vm4363_vm0, %v4364_v6 }
0x1043   :  { %v3070_v59 = vmax.f32 %v3067_v57, 0.0 }
0x1045   :  { %3767 = vmatmul.mubr.msk.f32.vlgmr.msra.gmra.mrb[30].mxu0 %vm570_vm3, %v3070_v59 }
0x1046   :  { %4166 = shalt.err (!%p4163_p1)
}
0x1047   :  { %s5210_s21 = sld [smem:[#allocation86_spill]] }
0x104d   :  { %s4167_s3 = scalar_lea.hbm %s5210_s21, 128 }
0x104e   :  { %p4168_p2 = scmp.ne.s32.totalorder %s5210_s21, %s4167_s3  ;;  %p4171_p3 = scmp.lt.u32.totalorder %s4167_s3, %s5210_s21 }
0x1050   :  { %p4173_p4 = pnand %p4171_p3, %p4168_p2 }
0x1052   :  { %4176 = shalt.err (!%p4173_p4)
}
0x1053   :  { %3180 = dma.vmem_to_hbm [thread:$0]  %s3178_s17, 128, %s5210_s21, [#allocation20]  }
0x1054   :  { %s4177_s24 = scalar_lea.vmem %s3198_s8, 128  ;;  %p4182_p6 = scmp.lt.s32.totalorder %s3198_s8, %s3198_s8 }
0x1055   :  { %p4178_p5 = scmp.ne.s32.totalorder %s3198_s8, %s4177_s24  ;;  %p4183_p7 = scmp.lt.s32.totalorder %s4177_s24, %s4177_s24 }
0x1057   :  { %p4184_p8 = por %p4183_p7, %p4182_p6 }
0x1059   :  { %p4185_p9 = pnand %p4184_p8, %p4178_p5 }
0x105b   :  { %4188 = shalt.err (!%p4185_p9)
}
0x105c   :  { %s4189_s26 = scalar_lea.hbm %s4718_s19, 128 }
0x105d   :  { %p4190_p10 = scmp.ne.s32.totalorder %s4718_s19, %s4189_s26  ;;  %p4193_p11 = scmp.lt.u32.totalorder %s4189_s26, %s4718_s19 }
0x105f   :  { %p4195_p12 = pnand %p4193_p11, %p4190_p10 }
0x1061   :  { %4198 = shalt.err (!%p4195_p12)
}
0x1062   :  { %s5211_s28 = sld [smem:[#allocation75_spill]]  ;;  %s5212_s1 = sld [smem:[#allocation79_spill]] }
0x1063   :  { %3200 = dma.vmem_to_hbm [thread:$0]  %s3198_s8, 128, %s4718_s19, [#allocation23]  }
0x1064   :  { %s4367_s2 = smov [#allocation18]   ;;  %s4368_s27 = smov [#allocation21]  }
0x1065   :  { %s3165_s7 = sshll.u32 %s4367_s2, 4  ;;  %s3187_s30 = sshll.u32 %s4368_s27, 4  ;;  %s3166_s7 = int_to_ptr.vmem [resolvable:$true] %s3165_s7  ;;  %s3188_s30 = int_to_ptr.vmem [resolvable:$true] %s3187_s30 }
0x1066   :  { %s4199_s10 = scalar_lea.vmem %s3166_s7, 128  ;;  %p4204_p0 = scmp.lt.s32.totalorder %s3166_s7, %s3166_s7 }
0x1067   :  { %p4200_p13 = scmp.ne.s32.totalorder %s3166_s7, %s4199_s10  ;;  %p4205_p1 = scmp.lt.s32.totalorder %s4199_s10, %s4199_s10 }
0x1068   :  { %v3373_v60 = vld [vmem:[%s5211_s28] ss:$0 sm:$0xff] }
0x1069   :  { %v3377_v61 = vld [vmem:[%s5212_s1] ss:$0 sm:$0xff]  ;;  %p4206_p2 = por %p4205_p1, %p4204_p0 }
0x106b   :  { %p4207_p3 = pnand %p4206_p2, %p4200_p13 }
0x1114   :  { %v2988_v3 = vpop.f32.mrb[28].mxu0 }
0x1115   :  { %v3756_v6 = vpop.f32.mrb[29].mxu0  ;;  %v2989_v63 = vadd.f32 %v3373_v60, %v2988_v3 }
0x1118   :  { %v3149_v62 = vpop.f32.mrb[30].mxu0 }
0x1119   :  { %v3150_v0 = vadd.f32 %v3377_v61, %v3149_v62  ;;  %v3768_v1 = vpop.f32.mrb[31].mxu0 }
0x111b   :  { %v3153_v2 = vmul.f32 %v3150_v0, %v2989_v63 }
0x111d   :  { %v3154_v4 = vsel %vm644_vm4, %v3153_v2, 0.0 }
0x111e   :  { %3155 = vadd.xlane.f32.xlu0 %v3154_v4 }
0x111f   :  { %4210 = shalt.err (!%p4207_p3)
}
0x1120   :  { %s5213_s19 = sld [smem:[#allocation84_spill]] }
0x1126   :  { %s4211_s11 = scalar_lea.hbm %s5213_s19, 128 }
0x1127   :  { %p4212_p4 = scmp.ne.s32.totalorder %s5213_s19, %s4211_s11  ;;  %p4215_p5 = scmp.lt.u32.totalorder %s4211_s11, %s5213_s19 }
0x1129   :  { %p4217_p6 = pnand %p4215_p5, %p4212_p4 }
0x112b   :  { %4220 = shalt.err (!%p4217_p6)
}
0x112c   :  { %3168 = dma.vmem_to_hbm [thread:$0]  %s3166_s7, 128, %s5213_s19, [#allocation4]  }
0x112d   :  { %s4221_s9 = scalar_lea.vmem %s3188_s30, 128  ;;  %p4226_p8 = scmp.lt.s32.totalorder %s3188_s30, %s3188_s30 }
0x112e   :  { %p4222_p7 = scmp.ne.s32.totalorder %s3188_s30, %s4221_s9  ;;  %p4227_p9 = scmp.lt.s32.totalorder %s4221_s9, %s4221_s9 }
0x1130   :  { %p4228_p10 = por %p4227_p9, %p4226_p8 }
0x1132   :  { %p4229_p11 = pnand %p4228_p10, %p4222_p7 }
0x1134   :  { %4232 = shalt.err (!%p4229_p11)
}
0x1135   :  { %s4233_s15 = scalar_lea.hbm %s4713_s29, 128 }
0x1136   :  { %p4234_p12 = scmp.ne.s32.totalorder %s4713_s29, %s4233_s15  ;;  %p4237_p13 = scmp.lt.u32.totalorder %s4233_s15, %s4713_s29 }
0x1138   :  { %p4239_p0 = pnand %p4237_p13, %p4234_p12 }
0x113a   :  { %4242 = shalt.err (!%p4239_p0)
}
0x113b   :  { %3190 = dma.vmem_to_hbm [thread:$0]  %s3188_s30, 128, %s4713_s29, [#allocation20]  }
0x113c   :  { %s4369_s16 = smov [#allocation24]  }
0x113d   :  { %s3207_s18 = sshll.u32 %s4369_s16, 4  ;;  %s3208_s18 = int_to_ptr.vmem [resolvable:$true] %s3207_s18 }
0x113e   :  { %s4243_s4 = scalar_lea.vmem %s3208_s18, 128  ;;  %p4248_p2 = scmp.lt.s32.totalorder %s3208_s18, %s3208_s18 }
0x113f   :  { %p4244_p1 = scmp.ne.s32.totalorder %s3208_s18, %s4243_s4  ;;  %p4249_p3 = scmp.lt.s32.totalorder %s4243_s4, %s4243_s4 }
0x1141   :  { %p4250_p4 = por %p4249_p3, %p4248_p2 }
0x1143   :  { %p4251_p5 = pnand %p4250_p4, %p4244_p1 }
0x1145   :  { %4254 = shalt.err (!%p4251_p5)
}
0x1146   :  { %s4255_s22 = scalar_lea.hbm %s4723_s6, 128 }
0x1147   :  { %p4256_p6 = scmp.ne.s32.totalorder %s4723_s6, %s4255_s22  ;;  %p4259_p7 = scmp.lt.u32.totalorder %s4255_s22, %s4723_s6 }
0x1149   :  { %p4261_p8 = pnand %p4259_p7, %p4256_p6 }
0x114b   :  { %4264 = shalt.err (!%p4261_p8)
}
0x114c   :  { %3210 = dma.vmem_to_hbm [thread:$0]  %s3208_s18, 128, %s4723_s6, [#allocation23]   ;;  %vm3157_vm6 = vcmask 7168  }
0x11ab   :  { %v3156_v5 = vpop.xlane.xlu0 %3155 }
0x11ac   :  { %3158 = vst.msk [vmem:[%s4728_s14] sm:$0xff] %vm3157_vm6, %v3156_v5 }
0x11ad   :  { %4277 = dma.done.wait [#allocation4], 128  }
0x11ae   :  { %4278 = vsyncadd [#allocation4], 4294967168 }
0x11af   :  { %4279 = dma.done.wait [#allocation20], 256  }
0x11b0   :  { %4280 = vsyncadd [#allocation20], 4294967040 }
0x11b1   :  { %4281 = dma.done.wait [#allocation23], 256  }
0x11b2   :  { %4282 = vsyncadd [#allocation23], 4294967040 }
0x11b3   :  { %3232 = vsyncpa [#allocation3], 1 }
0x11b4   :  { %3233 = vsyncpa [#allocation7], 1 }
0x11b5   :  { %3234 = vsyncpa [#allocation10], 1 }
0x11b6   :  { %3235 = vsyncpa [#allocation13], 1 }
0x11b7   :  { %3236 = vsyncpa [#allocation16], 1 }
0x11b8   :  { %3237 = vsyncpa [#allocation4], 1 }
0x11b9   :  { %3238 = vsyncpa [#allocation20], 1 }
0x11ba   :  { %3239 = vsyncpa [#allocation23], 1 }
0x11bb   :  { %3240 = vsyncpa [#allocation5], 1 }

</bundles_post_ra>
